<compile_context>
chip_gen: v7x
topology: tpu7x:2x2x1
jax: 0.10.0
libtpu: 0.0.40
codegen_flags: <defaults>
</compile_context>

<pallas_src>
import jax
import jax.numpy as jnp
from jax import lax
from jax.experimental import pallas as pl
from jax.experimental.pallas import tpu as pltpu

# ---------------- small synthetic sizes -----------------
B, S, O = 2, 8, 8          # batch, seq_length, num_objs
VOCAB, E = 32, 32          # vocab size, word-embedding dim
D, H, A = 32, 32, 16       # obj_dim, num_hid, num_answers

LP = 128                   # lane padding: every matmul output dim padded to 128
G3 = 3 * LP                # 3 GRU gate blocks, each 128 lanes wide
HEAD_OFF = 2 * G3          # lane offset of the head-weight blocks in the slab
W_ROWS = 2 * H             # 64 rows = max real K of any weight (classifier wc2)
W_COLS = 2 * G3 + 6 * LP   # embWih | W_hh | wva | wqa | wq | wv | wc1 | wc2
OUT_ROWS = ((B * S + 3 * B + 7) // 8) * 8   # packed output rows (24)

_VMEM = pl.BlockSpec(memory_space=pltpu.MemorySpace.VMEM)


# ======================================================================
# Fused kernel: one-hot embedding -> GRU (last hidden) -> v_att ->
#               mask_softmax -> attention pooling -> q_net/v_net ->
#               classifier.  Single grid point, everything VMEM-resident.
#
# Inputs (6 DMA descriptors total):
#   q_ref    [2*B*S, 1] int32  rows 0:16 batch-major ids, 16:32 time-major ids
#   v_ref    [B, O, D]  f32
#   mask_ref [B, O]     f32
#   emb_ref  [VOCAB,128] f32   embedding table (exact w_emb output only)
#   w_ref    [64, 1536] bf16   cols 0:384 embWih (emb@W_ih, per-gate 128 blocks)
#                              cols 384:768 W_hh | cols 768:1536 head blocks
#   b_ref    [8, 384]   f32    row0 bih(+bhh[r,z]) | row1 bhh[n] |
#                              row2 bva|bqa|bq | row3 bv|bc1|bc2 | row4 wl|bl
#
# Packed output ([24, 128] f32, fully initialized):
#   rows 0:16  lanes 0:E -> w_emb ; rows 16:18 lanes 0:A -> logits
#   rows 18:20 lanes 0:O -> att   ; rows 20:22 lanes 0:O -> att_2
# ======================================================================
def _fused_kernel(q_ref, v_ref, mask_ref, emb_ref, w_ref, b_ref, out_ref):
    f32, bf16 = jnp.float32, jnp.bfloat16

    # ---------- one-hot ids (both orderings built from one input) ----------
    ids = q_ref[...]                                            # [2*B*S, 1]
    iota = lax.broadcasted_iota(jnp.int32, (2 * B * S, VOCAB), 1)
    onehot = (ids == iota).astype(f32)                          # [32, VOCAB]

    # ---------- w_emb output: exact f32 embedding lookup (batch-major) -----
    w_emb_bm = jnp.dot(onehot[:B * S], emb_ref[...],
                       preferred_element_type=f32)              # [B*S, 128]

    # ---------- GRU: emb@W_ih folded offline, hoisted gi, unrolled loop ----
    emb_wih = w_ref[0:VOCAB, 0:G3]                              # [32, 384] bf16
    whh = w_ref[0:H, G3:2 * G3]                                 # [32, 384] bf16
    bih = b_ref[0:1, :]                                         # [1, 384] (b_hh[r,z] folded in)
    bhn = b_ref[1:2, 0:H]                                       # [1, H]   (n-gate b_hh)

    gi_all = jnp.dot(onehot[B * S:].astype(bf16), emb_wih,
                     preferred_element_type=f32) + bih          # [S*B, 384]

    h = jnp.zeros((B, H), f32)
    for t in range(S):                     # static unroll (S small & fixed)
        gi = gi_all[t * B:(t + 1) * B, :]                       # [B, 384]
        gh = jnp.dot(h.astype(bf16), whh,
                     preferred_element_type=f32)                # [B, 384]
        rz = jax.nn.sigmoid(gi[:, 0:2 * LP] + gh[:, 0:2 * LP])  # r|z, one add
        r = rz[:, 0:H]
        z = rz[:, LP:LP + H]
        n = jnp.tanh(gi[:, 2 * LP:2 * LP + H]
                     + r * (gh[:, 2 * LP:2 * LP + H] + bhn))
        h = (1.0 - z) * n + z * h
    q_emb = h                                                   # [B, H]
    # TODO(synk): at production batch, pad B to a multiple of 8 sublanes
    # (ideally >=128 rows) so each recurrence step fills an MXU tile, and on
    # v7x add a "parallel" batch grid axis so both TensorCores are used.

    # ---------- head weights (bf16, row-trimmed) and biases -----------------
    wva = w_ref[0:D, HEAD_OFF + 0 * LP:HEAD_OFF + 1 * LP]       # [D, 128]
    wqa = w_ref[0:H, HEAD_OFF + 1 * LP:HEAD_OFF + 2 * LP]       # [H, 128]
    wq = w_ref[0:H, HEAD_OFF + 2 * LP:HEAD_OFF + 3 * LP]        # [H, 128]
    wv = w_ref[0:D, HEAD_OFF + 3 * LP:HEAD_OFF + 4 * LP]        # [D, 128]
    wc1 = w_ref[0:H, HEAD_OFF + 4 * LP:HEAD_OFF + 5 * LP]       # [H, 128]
    wc2 = w_ref[0:2 * H, HEAD_OFF + 5 * LP:HEAD_OFF + 6 * LP]   # [2H, 128]
    bva = b_ref[2:3, 0:LP]
    bqa = b_ref[2:3, LP:2 * LP]
    bq = b_ref[2:3, 2 * LP:3 * LP]
    bv = b_ref[3:4, 0:LP]
    bc1 = b_ref[3:4, LP:2 * LP]
    bc2 = b_ref[3:4, 2 * LP:3 * LP]
    wl = b_ref[4:5, 0:LP]                  # the [H,1] attention proj, as a row
    bl = b_ref[4:5, LP:LP + 1]             # [1, 1]

    # ---------- v_att: att_logit = Linear( relu(vW) * relu(qW) ) -----------
    v = v_ref[...]                                              # [B, O, D]
    v2d = v.reshape(B * O, D)
    vp = jnp.maximum(jnp.dot(v2d.astype(bf16), wva,
                             preferred_element_type=f32) + bva, 0.0)
    qp = jnp.maximum(jnp.dot(q_emb.astype(bf16), wqa,
                             preferred_element_type=f32) + bqa, 0.0)
    joint_att = vp.reshape(B, O, LP) * qp[:, None, :]           # [B, O, 128]
    # Cross-lane reduce is free XLU filler at O=8/H=32.
    # TODO(synk): at production O/D express as (B*O,H)@[H,1] on the MXU.
    a_logit = jnp.sum(joint_att * wl[None, :, :], axis=-1) + bl  # [B, O]
    att_2 = 1.0 - a_logit                                        # pre-softmax

    # ---------- mask_softmax (GLOBAL max, matching torch.max(x)) -----------
    x2 = jnp.exp(a_logit - jnp.max(a_logit))
    x3 = x2 * mask_ref[...]
    x3_sum = jnp.sum(x3, axis=1, keepdims=True) + 1e-5
    att = x3 / x3_sum                                            # exact divide

    # ---------- attention pooling, q_net / v_net, classifier ----------------
    # TODO(synk): switch pooling to a batched einsum (MXU) at production O/D.
    v_emb = jnp.sum(att[:, :, None] * v, axis=1)                 # [B, D]
    q_repr = jnp.maximum(jnp.dot(q_emb.astype(bf16), wq,
                                 preferred_element_type=f32) + bq, 0.0)
    v_repr = jnp.maximum(jnp.dot(v_emb.astype(bf16), wv,
                                 preferred_element_type=f32) + bv, 0.0)
    joint_repr = v_repr * q_repr                                 # [B, 128] (lanes>=H are 0)
    h1 = jnp.maximum(jnp.dot(joint_repr[:, 0:H].astype(bf16), wc1,
                             preferred_element_type=f32) + bc1, 0.0)
    logits = jnp.dot(h1[:, 0:2 * H].astype(bf16), wc2,
                     preferred_element_type=f32) + bc2           # [B, 128]

    # ---------- packed, fully-initialized output -----------------------------
    out_ref[...] = jnp.zeros_like(out_ref)
    out_ref[0:B * S, :] = w_emb_bm
    out_ref[B * S:B * S + B, :] = logits
    out_ref[B * S + B:B * S + 2 * B, 0:O] = att
    out_ref[B * S + 2 * B:B * S + 3 * B, 0:O] = att_2


# ======================================================================
# Parameter init (deterministic, synthetic) and packing
# ======================================================================
def _pack_params(p):
    f32, bf16 = jnp.float32, jnp.bfloat16

    # f32 embedding table (only used for the exact w_emb output)
    emb_f32 = jnp.zeros((VOCAB, LP), f32).at[:, :E].set(p["emb"])

    # single bf16 weight slab, row-trimmed to the real contraction dims
    emb_wih = p["emb"] @ p["gru_wih"]                      # fold emb into W_ih
    w = jnp.zeros((W_ROWS, W_COLS), f32)
    for g in range(3):                                     # torch gate order r, z, n
        w = w.at[:VOCAB, g * LP:g * LP + H].set(emb_wih[:, g * H:(g + 1) * H])
        w = w.at[:H, G3 + g * LP:G3 + g * LP + H].set(
            p["gru_whh"][:, g * H:(g + 1) * H])
    w = w.at[:D, HEAD_OFF + 0 * LP:HEAD_OFF + 0 * LP + H].set(p["wva"])
    w = w.at[:H, HEAD_OFF + 1 * LP:HEAD_OFF + 1 * LP + H].set(p["wqa"])
    w = w.at[:H, HEAD_OFF + 2 * LP:HEAD_OFF + 2 * LP + H].set(p["wq"])
    w = w.at[:D, HEAD_OFF + 3 * LP:HEAD_OFF + 3 * LP + H].set(p["wv"])
    w = w.at[:H, HEAD_OFF + 4 * LP:HEAD_OFF + 4 * LP + 2 * H].set(p["wc1"])
    w = w.at[:2 * H, HEAD_OFF + 5 * LP:HEAD_OFF + 5 * LP + A].set(p["wc2"])
    w_bf16 = w.astype(bf16)

    # single f32 bias slab
    b = jnp.zeros((8, G3), f32)
    for g in range(3):
        bi = p["gru_bih"][g * H:(g + 1) * H]
        if g < 2:                                          # fold b_hh for r, z gates
            bi = bi + p["gru_bhh"][g * H:(g + 1) * H]
        b = b.at[0, g * LP:g * LP + H].set(bi)
    b = b.at[1, :H].set(p["gru_bhh"][2 * H:3 * H])         # n-gate b_hh
    b = b.at[2, 0:H].set(p["bva"])
    b = b.at[2, LP:LP + H].set(p["bqa"])
    b = b.at[2, 2 * LP:2 * LP + H].set(p["bq"])
    b = b.at[3, 0:H].set(p["bv"])
    b = b.at[3, LP:LP + 2 * H].set(p["bc1"])
    b = b.at[3, 2 * LP:2 * LP + A].set(p["bc2"])
    b = b.at[4, :H].set(p["wl"][:, 0])
    b = b.at[4, LP].set(p["bl"][0])

    # TODO(synk): at production dims tile matmul N in multiples of 256 on
    # v6e/v7x (128 on v5e), add a grid over batch/answer blocks, and re-derive
    # the VMEM budget for v7x's 64 MiB with vmem_limit_bytes headroom.
    return dict(emb_f32=emb_f32, w_bf16=w_bf16, b_f32=b)


def init_params(key):
    ks = jax.random.split(key, 12)
    lin = lambda k, fi, fo: jax.random.normal(k, (fi, fo), jnp.float32) * 0.05
    raw = dict(
        emb=jax.random.normal(ks[0], (VOCAB, E), jnp.float32) * 0.05,
        gru_wih=lin(ks[1], E, 3 * H), gru_whh=lin(ks[2], H, 3 * H),
        gru_bih=jnp.zeros((3 * H,), jnp.float32),
        gru_bhh=jnp.zeros((3 * H,), jnp.float32),
        # v_att
        wva=lin(ks[3], D, H), bva=jnp.zeros((H,), jnp.float32),
        wqa=lin(ks[4], H, H), bqa=jnp.zeros((H,), jnp.float32),
        wl=lin(ks[5], H, 1), bl=jnp.zeros((1,), jnp.float32),
        # q_net / v_net
        wq=lin(ks[6], H, H), bq=jnp.zeros((H,), jnp.float32),
        wv=lin(ks[7], D, H), bv=jnp.zeros((H,), jnp.float32),
        # classifier
        wc1=lin(ks[8], H, 2 * H), bc1=jnp.zeros((2 * H,), jnp.float32),
        wc2=lin(ks[9], 2 * H, A), bc2=jnp.zeros((A,), jnp.float32),
    )
    return _pack_params(raw)


# ======================================================================
# Forward wrapper: one fused pallas_call, then cheap slicing of the
# packed output.
# ======================================================================
@jax.jit
def base_model_forward(params, v, q, v_mask):
    """labels=None, v_mask given  ->  (logits, None, w_emb, att, att_2)."""
    q = q.astype(jnp.int32)
    q_bm = q.reshape(B * S, 1)                          # batch-major token ids
    q_tm = jnp.transpose(q, (1, 0)).reshape(S * B, 1)   # time-major token ids
    q_ids = jnp.concatenate([q_bm, q_tm], axis=0)       # one input, one DMA

    out = pl.pallas_call(
        _fused_kernel,
        out_shape=jax.ShapeDtypeStruct((OUT_ROWS, LP), jnp.float32),
        in_specs=[_VMEM] * 6,
        out_specs=_VMEM,
    )(q_ids, v, v_mask.astype(jnp.float32),
      params["emb_f32"], params["w_bf16"], params["b_f32"])

    w_emb = out[0:B * S, 0:E].reshape(B, S, E)                    # [B, S, E]
    logits = out[B * S:B * S + B, 0:A]                            # [B, A]
    att = out[B * S + B:B * S + 2 * B, 0:O][:, :, None]           # [B, O, 1]
    att_2 = out[B * S + 2 * B:B * S + 3 * B, 0:O][:, :, None]     # [B, O, 1]
    # TODO(synk): Generator / Discriminator / c_1 / c_2 / bias_lin /
    # SimpleLinearNet and all label-dependent losses are skipped: they are
    # undefined submodules whose outputs do not reach the `labels is None`
    # return tuple (and debias_loss_fn is None in __init__).
    return logits, None, w_emb, att, att_2


if __name__ == "__main__":
    key = jax.random.PRNGKey(0)
    kp, kv, kq, km = jax.random.split(key, 4)

    params = init_params(kp)
    v = jax.random.normal(kv, (B, O, D), jnp.float32)        # [batch, num_objs, obj_dim]
    q = jax.random.randint(kq, (B, S), 0, VOCAB, jnp.int32)  # [batch, seq_length]
    v_mask = (jax.random.uniform(km, (B, O)) > 0.3).astype(jnp.float32)

    logits, loss, w_emb, att, att_2 = base_model_forward(params, v, q, v_mask)
    jax.block_until_ready((logits, w_emb, att, att_2))

    assert logits.shape == (B, A)
    assert w_emb.shape == (B, S, E)
    assert att.shape == (B, O, 1) and att_2.shape == (B, O, 1)
    assert loss is None
    print("KERNEL_OK")
</pallas_src>

<mosaic_0001>
module attributes {stable_mosaic.version = 11 : i64} {
  func.func @_fused_kernel(%arg0: memref<32x1xi32, #tpu.memory_space<vmem>>, %arg1: memref<2x8x32xf32, #tpu.memory_space<vmem>>, %arg2: memref<2x8xf32, #tpu.memory_space<vmem>>, %arg3: memref<32x128xf32, #tpu.memory_space<vmem>>, %arg4: memref<64x1536xbf16, #tpu.memory_space<vmem>>, %arg5: memref<8x384xf32, #tpu.memory_space<vmem>>, %arg6: memref<24x128xf32, #tpu.memory_space<vmem>>) attributes {dimension_semantics = [], scalar_prefetch = 0 : i64, scratch_operands = 0 : i64, tpu.core_type = #tpu.core_type<tc>} {
    %c0 = arith.constant 0 : index
    %c0_0 = arith.constant 0 : index
    %0 = vector.load %arg0[%c0, %c0_0] : memref<32x1xi32, #tpu.memory_space<vmem>>, vector<32x1xi32>
    %1 = tpu.iota {dimensions = array<i32: 1>} : vector<32x32xi32>
    %2 = vector.broadcast %0 : vector<32x1xi32> to vector<32x32xi32>
    %3 = arith.cmpi eq, %2, %1 : vector<32x32xi32>
    %4 = arith.extui %3 : vector<32x32xi1> to vector<32x32xi32>
    %5 = arith.sitofp %4 : vector<32x32xi32> to vector<32x32xf32>
    %6 = vector.extract_strided_slice %5 {offsets = [0, 0], sizes = [16, 32], strides = [1, 1]} : vector<32x32xf32> to vector<16x32xf32>
    %c0_1 = arith.constant 0 : index
    %c0_2 = arith.constant 0 : index
    %7 = vector.load %arg3[%c0_1, %c0_2] : memref<32x128xf32, #tpu.memory_space<vmem>>, vector<32x128xf32>
    %cst = arith.constant dense<0.000000e+00> : vector<16x128xf32>
    %8 = tpu.matmul %6, %7, %cst {dimension_numbers = #tpu.dot_dimension_numbers<[1], [0], [0], [1], [0, 0, 1, 1], [], []>} : vector<16x32xf32>, vector<32x128xf32>, vector<16x128xf32> -> vector<16x128xf32>
    %c0_3 = arith.constant 0 : index
    %c0_4 = arith.constant 0 : index
    %9 = vector.load %arg4[%c0_3, %c0_4] : memref<64x1536xbf16, #tpu.memory_space<vmem>>, vector<32x384xbf16>
    %c0_5 = arith.constant 0 : index
    %c384 = arith.constant 384 : index
    %10 = vector.load %arg4[%c0_5, %c384] : memref<64x1536xbf16, #tpu.memory_space<vmem>>, vector<32x384xbf16>
    %c0_6 = arith.constant 0 : index
    %c0_7 = arith.constant 0 : index
    %11 = vector.load %arg5[%c0_6, %c0_7] : memref<8x384xf32, #tpu.memory_space<vmem>>, vector<1x384xf32>
    %c1 = arith.constant 1 : index
    %c0_8 = arith.constant 0 : index
    %12 = vector.load %arg5[%c1, %c0_8] : memref<8x384xf32, #tpu.memory_space<vmem>>, vector<1x32xf32>
    %13 = vector.extract_strided_slice %5 {offsets = [16, 0], sizes = [16, 32], strides = [1, 1]} : vector<32x32xf32> to vector<16x32xf32>
    %14 = arith.truncf %13 : vector<16x32xf32> to vector<16x32xbf16>
    %cst_9 = arith.constant dense<0.000000e+00> : vector<16x384xf32>
    %15 = tpu.matmul %14, %9, %cst_9 {dimension_numbers = #tpu.dot_dimension_numbers<[1], [0], [0], [1], [0, 0, 1, 1], [], []>} : vector<16x32xbf16>, vector<32x384xbf16>, vector<16x384xf32> -> vector<16x384xf32>
    %16 = vector.broadcast %11 : vector<1x384xf32> to vector<16x384xf32>
    %17 = arith.addf %15, %16 : vector<16x384xf32>
    %cst_10 = arith.constant 0.000000e+00 : f32
    %18 = vector.broadcast %cst_10 : f32 to vector<2x32xf32>
    %19 = vector.extract_strided_slice %17 {offsets = [0, 0], sizes = [2, 384], strides = [1, 1]} : vector<16x384xf32> to vector<2x384xf32>
    %20 = arith.truncf %18 : vector<2x32xf32> to vector<2x32xbf16>
    %cst_11 = arith.constant dense<0.000000e+00> : vector<2x384xf32>
    %21 = tpu.matmul %20, %10, %cst_11 {dimension_numbers = #tpu.dot_dimension_numbers<[1], [0], [0], [1], [0, 0, 1, 1], [], []>} : vector<2x32xbf16>, vector<32x384xbf16>, vector<2x384xf32> -> vector<2x384xf32>
    %22 = vector.extract_strided_slice %19 {offsets = [0, 0], sizes = [2, 256], strides = [1, 1]} : vector<2x384xf32> to vector<2x256xf32>
    %23 = vector.extract_strided_slice %21 {offsets = [0, 0], sizes = [2, 256], strides = [1, 1]} : vector<2x384xf32> to vector<2x256xf32>
    %24 = arith.addf %22, %23 : vector<2x256xf32>
    %25 = arith.negf %24 : vector<2x256xf32>
    %26 = math.exp %25 : vector<2x256xf32>
    %cst_12 = arith.constant 1.000000e+00 : f32
    %27 = vector.broadcast %cst_12 : f32 to vector<2x256xf32>
    %28 = arith.addf %27, %26 : vector<2x256xf32>
    %29 = arith.divf %27, %28 : vector<2x256xf32>
    %30 = vector.extract_strided_slice %29 {offsets = [0, 0], sizes = [2, 32], strides = [1, 1]} : vector<2x256xf32> to vector<2x32xf32>
    %31 = vector.extract_strided_slice %29 {offsets = [0, 128], sizes = [2, 32], strides = [1, 1]} : vector<2x256xf32> to vector<2x32xf32>
    %32 = vector.extract_strided_slice %19 {offsets = [0, 256], sizes = [2, 32], strides = [1, 1]} : vector<2x384xf32> to vector<2x32xf32>
    %33 = vector.extract_strided_slice %21 {offsets = [0, 256], sizes = [2, 32], strides = [1, 1]} : vector<2x384xf32> to vector<2x32xf32>
    %34 = vector.broadcast %12 : vector<1x32xf32> to vector<2x32xf32>
    %35 = arith.addf %33, %34 : vector<2x32xf32>
    %36 = arith.mulf %30, %35 : vector<2x32xf32>
    %37 = arith.addf %32, %36 : vector<2x32xf32>
    %38 = math.tanh %37 : vector<2x32xf32>
    %cst_13 = arith.constant 1.000000e+00 : f32
    %39 = vector.broadcast %cst_13 : f32 to vector<2x32xf32>
    %40 = arith.subf %39, %31 : vector<2x32xf32>
    %41 = arith.mulf %40, %38 : vector<2x32xf32>
    %42 = arith.mulf %31, %18 : vector<2x32xf32>
    %43 = arith.addf %41, %42 : vector<2x32xf32>
    %44 = vector.extract_strided_slice %17 {offsets = [2, 0], sizes = [2, 384], strides = [1, 1]} : vector<16x384xf32> to vector<2x384xf32>
    %45 = arith.truncf %43 : vector<2x32xf32> to vector<2x32xbf16>
    %cst_14 = arith.constant dense<0.000000e+00> : vector<2x384xf32>
    %46 = tpu.matmul %45, %10, %cst_14 {dimension_numbers = #tpu.dot_dimension_numbers<[1], [0], [0], [1], [0, 0, 1, 1], [], []>} : vector<2x32xbf16>, vector<32x384xbf16>, vector<2x384xf32> -> vector<2x384xf32>
    %47 = vector.extract_strided_slice %44 {offsets = [0, 0], sizes = [2, 256], strides = [1, 1]} : vector<2x384xf32> to vector<2x256xf32>
    %48 = vector.extract_strided_slice %46 {offsets = [0, 0], sizes = [2, 256], strides = [1, 1]} : vector<2x384xf32> to vector<2x256xf32>
    %49 = arith.addf %47, %48 : vector<2x256xf32>
    %50 = arith.negf %49 : vector<2x256xf32>
    %51 = math.exp %50 : vector<2x256xf32>
    %cst_15 = arith.constant 1.000000e+00 : f32
    %52 = vector.broadcast %cst_15 : f32 to vector<2x256xf32>
    %53 = arith.addf %52, %51 : vector<2x256xf32>
    %54 = arith.divf %52, %53 : vector<2x256xf32>
    %55 = vector.extract_strided_slice %54 {offsets = [0, 0], sizes = [2, 32], strides = [1, 1]} : vector<2x256xf32> to vector<2x32xf32>
    %56 = vector.extract_strided_slice %54 {offsets = [0, 128], sizes = [2, 32], strides = [1, 1]} : vector<2x256xf32> to vector<2x32xf32>
    %57 = vector.extract_strided_slice %44 {offsets = [0, 256], sizes = [2, 32], strides = [1, 1]} : vector<2x384xf32> to vector<2x32xf32>
    %58 = vector.extract_strided_slice %46 {offsets = [0, 256], sizes = [2, 32], strides = [1, 1]} : vector<2x384xf32> to vector<2x32xf32>
    %59 = vector.broadcast %12 : vector<1x32xf32> to vector<2x32xf32>
    %60 = arith.addf %58, %59 : vector<2x32xf32>
    %61 = arith.mulf %55, %60 : vector<2x32xf32>
    %62 = arith.addf %57, %61 : vector<2x32xf32>
    %63 = math.tanh %62 : vector<2x32xf32>
    %cst_16 = arith.constant 1.000000e+00 : f32
    %64 = vector.broadcast %cst_16 : f32 to vector<2x32xf32>
    %65 = arith.subf %64, %56 : vector<2x32xf32>
    %66 = arith.mulf %65, %63 : vector<2x32xf32>
    %67 = arith.mulf %56, %43 : vector<2x32xf32>
    %68 = arith.addf %66, %67 : vector<2x32xf32>
    %69 = vector.extract_strided_slice %17 {offsets = [4, 0], sizes = [2, 384], strides = [1, 1]} : vector<16x384xf32> to vector<2x384xf32>
    %70 = arith.truncf %68 : vector<2x32xf32> to vector<2x32xbf16>
    %cst_17 = arith.constant dense<0.000000e+00> : vector<2x384xf32>
    %71 = tpu.matmul %70, %10, %cst_17 {dimension_numbers = #tpu.dot_dimension_numbers<[1], [0], [0], [1], [0, 0, 1, 1], [], []>} : vector<2x32xbf16>, vector<32x384xbf16>, vector<2x384xf32> -> vector<2x384xf32>
    %72 = vector.extract_strided_slice %69 {offsets = [0, 0], sizes = [2, 256], strides = [1, 1]} : vector<2x384xf32> to vector<2x256xf32>
    %73 = vector.extract_strided_slice %71 {offsets = [0, 0], sizes = [2, 256], strides = [1, 1]} : vector<2x384xf32> to vector<2x256xf32>
    %74 = arith.addf %72, %73 : vector<2x256xf32>
    %75 = arith.negf %74 : vector<2x256xf32>
    %76 = math.exp %75 : vector<2x256xf32>
    %cst_18 = arith.constant 1.000000e+00 : f32
    %77 = vector.broadcast %cst_18 : f32 to vector<2x256xf32>
    %78 = arith.addf %77, %76 : vector<2x256xf32>
    %79 = arith.divf %77, %78 : vector<2x256xf32>
    %80 = vector.extract_strided_slice %79 {offsets = [0, 0], sizes = [2, 32], strides = [1, 1]} : vector<2x256xf32> to vector<2x32xf32>
    %81 = vector.extract_strided_slice %79 {offsets = [0, 128], sizes = [2, 32], strides = [1, 1]} : vector<2x256xf32> to vector<2x32xf32>
    %82 = vector.extract_strided_slice %69 {offsets = [0, 256], sizes = [2, 32], strides = [1, 1]} : vector<2x384xf32> to vector<2x32xf32>
    %83 = vector.extract_strided_slice %71 {offsets = [0, 256], sizes = [2, 32], strides = [1, 1]} : vector<2x384xf32> to vector<2x32xf32>
    %84 = vector.broadcast %12 : vector<1x32xf32> to vector<2x32xf32>
    %85 = arith.addf %83, %84 : vector<2x32xf32>
    %86 = arith.mulf %80, %85 : vector<2x32xf32>
    %87 = arith.addf %82, %86 : vector<2x32xf32>
    %88 = math.tanh %87 : vector<2x32xf32>
    %cst_19 = arith.constant 1.000000e+00 : f32
    %89 = vector.broadcast %cst_19 : f32 to vector<2x32xf32>
    %90 = arith.subf %89, %81 : vector<2x32xf32>
    %91 = arith.mulf %90, %88 : vector<2x32xf32>
    %92 = arith.mulf %81, %68 : vector<2x32xf32>
    %93 = arith.addf %91, %92 : vector<2x32xf32>
    %94 = vector.extract_strided_slice %17 {offsets = [6, 0], sizes = [2, 384], strides = [1, 1]} : vector<16x384xf32> to vector<2x384xf32>
    %95 = arith.truncf %93 : vector<2x32xf32> to vector<2x32xbf16>
    %cst_20 = arith.constant dense<0.000000e+00> : vector<2x384xf32>
    %96 = tpu.matmul %95, %10, %cst_20 {dimension_numbers = #tpu.dot_dimension_numbers<[1], [0], [0], [1], [0, 0, 1, 1], [], []>} : vector<2x32xbf16>, vector<32x384xbf16>, vector<2x384xf32> -> vector<2x384xf32>
    %97 = vector.extract_strided_slice %94 {offsets = [0, 0], sizes = [2, 256], strides = [1, 1]} : vector<2x384xf32> to vector<2x256xf32>
    %98 = vector.extract_strided_slice %96 {offsets = [0, 0], sizes = [2, 256], strides = [1, 1]} : vector<2x384xf32> to vector<2x256xf32>
    %99 = arith.addf %97, %98 : vector<2x256xf32>
    %100 = arith.negf %99 : vector<2x256xf32>
    %101 = math.exp %100 : vector<2x256xf32>
    %cst_21 = arith.constant 1.000000e+00 : f32
    %102 = vector.broadcast %cst_21 : f32 to vector<2x256xf32>
    %103 = arith.addf %102, %101 : vector<2x256xf32>
    %104 = arith.divf %102, %103 : vector<2x256xf32>
    %105 = vector.extract_strided_slice %104 {offsets = [0, 0], sizes = [2, 32], strides = [1, 1]} : vector<2x256xf32> to vector<2x32xf32>
    %106 = vector.extract_strided_slice %104 {offsets = [0, 128], sizes = [2, 32], strides = [1, 1]} : vector<2x256xf32> to vector<2x32xf32>
    %107 = vector.extract_strided_slice %94 {offsets = [0, 256], sizes = [2, 32], strides = [1, 1]} : vector<2x384xf32> to vector<2x32xf32>
    %108 = vector.extract_strided_slice %96 {offsets = [0, 256], sizes = [2, 32], strides = [1, 1]} : vector<2x384xf32> to vector<2x32xf32>
    %109 = vector.broadcast %12 : vector<1x32xf32> to vector<2x32xf32>
    %110 = arith.addf %108, %109 : vector<2x32xf32>
    %111 = arith.mulf %105, %110 : vector<2x32xf32>
    %112 = arith.addf %107, %111 : vector<2x32xf32>
    %113 = math.tanh %112 : vector<2x32xf32>
    %cst_22 = arith.constant 1.000000e+00 : f32
    %114 = vector.broadcast %cst_22 : f32 to vector<2x32xf32>
    %115 = arith.subf %114, %106 : vector<2x32xf32>
    %116 = arith.mulf %115, %113 : vector<2x32xf32>
    %117 = arith.mulf %106, %93 : vector<2x32xf32>
    %118 = arith.addf %116, %117 : vector<2x32xf32>
    %119 = vector.extract_strided_slice %17 {offsets = [8, 0], sizes = [2, 384], strides = [1, 1]} : vector<16x384xf32> to vector<2x384xf32>
    %120 = arith.truncf %118 : vector<2x32xf32> to vector<2x32xbf16>
    %cst_23 = arith.constant dense<0.000000e+00> : vector<2x384xf32>
    %121 = tpu.matmul %120, %10, %cst_23 {dimension_numbers = #tpu.dot_dimension_numbers<[1], [0], [0], [1], [0, 0, 1, 1], [], []>} : vector<2x32xbf16>, vector<32x384xbf16>, vector<2x384xf32> -> vector<2x384xf32>
    %122 = vector.extract_strided_slice %119 {offsets = [0, 0], sizes = [2, 256], strides = [1, 1]} : vector<2x384xf32> to vector<2x256xf32>
    %123 = vector.extract_strided_slice %121 {offsets = [0, 0], sizes = [2, 256], strides = [1, 1]} : vector<2x384xf32> to vector<2x256xf32>
    %124 = arith.addf %122, %123 : vector<2x256xf32>
    %125 = arith.negf %124 : vector<2x256xf32>
    %126 = math.exp %125 : vector<2x256xf32>
    %cst_24 = arith.constant 1.000000e+00 : f32
    %127 = vector.broadcast %cst_24 : f32 to vector<2x256xf32>
    %128 = arith.addf %127, %126 : vector<2x256xf32>
    %129 = arith.divf %127, %128 : vector<2x256xf32>
    %130 = vector.extract_strided_slice %129 {offsets = [0, 0], sizes = [2, 32], strides = [1, 1]} : vector<2x256xf32> to vector<2x32xf32>
    %131 = vector.extract_strided_slice %129 {offsets = [0, 128], sizes = [2, 32], strides = [1, 1]} : vector<2x256xf32> to vector<2x32xf32>
    %132 = vector.extract_strided_slice %119 {offsets = [0, 256], sizes = [2, 32], strides = [1, 1]} : vector<2x384xf32> to vector<2x32xf32>
    %133 = vector.extract_strided_slice %121 {offsets = [0, 256], sizes = [2, 32], strides = [1, 1]} : vector<2x384xf32> to vector<2x32xf32>
    %134 = vector.broadcast %12 : vector<1x32xf32> to vector<2x32xf32>
    %135 = arith.addf %133, %134 : vector<2x32xf32>
    %136 = arith.mulf %130, %135 : vector<2x32xf32>
    %137 = arith.addf %132, %136 : vector<2x32xf32>
    %138 = math.tanh %137 : vector<2x32xf32>
    %cst_25 = arith.constant 1.000000e+00 : f32
    %139 = vector.broadcast %cst_25 : f32 to vector<2x32xf32>
    %140 = arith.subf %139, %131 : vector<2x32xf32>
    %141 = arith.mulf %140, %138 : vector<2x32xf32>
    %142 = arith.mulf %131, %118 : vector<2x32xf32>
    %143 = arith.addf %141, %142 : vector<2x32xf32>
    %144 = vector.extract_strided_slice %17 {offsets = [10, 0], sizes = [2, 384], strides = [1, 1]} : vector<16x384xf32> to vector<2x384xf32>
    %145 = arith.truncf %143 : vector<2x32xf32> to vector<2x32xbf16>
    %cst_26 = arith.constant dense<0.000000e+00> : vector<2x384xf32>
    %146 = tpu.matmul %145, %10, %cst_26 {dimension_numbers = #tpu.dot_dimension_numbers<[1], [0], [0], [1], [0, 0, 1, 1], [], []>} : vector<2x32xbf16>, vector<32x384xbf16>, vector<2x384xf32> -> vector<2x384xf32>
    %147 = vector.extract_strided_slice %144 {offsets = [0, 0], sizes = [2, 256], strides = [1, 1]} : vector<2x384xf32> to vector<2x256xf32>
    %148 = vector.extract_strided_slice %146 {offsets = [0, 0], sizes = [2, 256], strides = [1, 1]} : vector<2x384xf32> to vector<2x256xf32>
    %149 = arith.addf %147, %148 : vector<2x256xf32>
    %150 = arith.negf %149 : vector<2x256xf32>
    %151 = math.exp %150 : vector<2x256xf32>
    %cst_27 = arith.constant 1.000000e+00 : f32
    %152 = vector.broadcast %cst_27 : f32 to vector<2x256xf32>
    %153 = arith.addf %152, %151 : vector<2x256xf32>
    %154 = arith.divf %152, %153 : vector<2x256xf32>
    %155 = vector.extract_strided_slice %154 {offsets = [0, 0], sizes = [2, 32], strides = [1, 1]} : vector<2x256xf32> to vector<2x32xf32>
    %156 = vector.extract_strided_slice %154 {offsets = [0, 128], sizes = [2, 32], strides = [1, 1]} : vector<2x256xf32> to vector<2x32xf32>
    %157 = vector.extract_strided_slice %144 {offsets = [0, 256], sizes = [2, 32], strides = [1, 1]} : vector<2x384xf32> to vector<2x32xf32>
    %158 = vector.extract_strided_slice %146 {offsets = [0, 256], sizes = [2, 32], strides = [1, 1]} : vector<2x384xf32> to vector<2x32xf32>
    %159 = vector.broadcast %12 : vector<1x32xf32> to vector<2x32xf32>
    %160 = arith.addf %158, %159 : vector<2x32xf32>
    %161 = arith.mulf %155, %160 : vector<2x32xf32>
    %162 = arith.addf %157, %161 : vector<2x32xf32>
    %163 = math.tanh %162 : vector<2x32xf32>
    %cst_28 = arith.constant 1.000000e+00 : f32
    %164 = vector.broadcast %cst_28 : f32 to vector<2x32xf32>
    %165 = arith.subf %164, %156 : vector<2x32xf32>
    %166 = arith.mulf %165, %163 : vector<2x32xf32>
    %167 = arith.mulf %156, %143 : vector<2x32xf32>
    %168 = arith.addf %166, %167 : vector<2x32xf32>
    %169 = vector.extract_strided_slice %17 {offsets = [12, 0], sizes = [2, 384], strides = [1, 1]} : vector<16x384xf32> to vector<2x384xf32>
    %170 = arith.truncf %168 : vector<2x32xf32> to vector<2x32xbf16>
    %cst_29 = arith.constant dense<0.000000e+00> : vector<2x384xf32>
    %171 = tpu.matmul %170, %10, %cst_29 {dimension_numbers = #tpu.dot_dimension_numbers<[1], [0], [0], [1], [0, 0, 1, 1], [], []>} : vector<2x32xbf16>, vector<32x384xbf16>, vector<2x384xf32> -> vector<2x384xf32>
    %172 = vector.extract_strided_slice %169 {offsets = [0, 0], sizes = [2, 256], strides = [1, 1]} : vector<2x384xf32> to vector<2x256xf32>
    %173 = vector.extract_strided_slice %171 {offsets = [0, 0], sizes = [2, 256], strides = [1, 1]} : vector<2x384xf32> to vector<2x256xf32>
    %174 = arith.addf %172, %173 : vector<2x256xf32>
    %175 = arith.negf %174 : vector<2x256xf32>
    %176 = math.exp %175 : vector<2x256xf32>
    %cst_30 = arith.constant 1.000000e+00 : f32
    %177 = vector.broadcast %cst_30 : f32 to vector<2x256xf32>
    %178 = arith.addf %177, %176 : vector<2x256xf32>
    %179 = arith.divf %177, %178 : vector<2x256xf32>
    %180 = vector.extract_strided_slice %179 {offsets = [0, 0], sizes = [2, 32], strides = [1, 1]} : vector<2x256xf32> to vector<2x32xf32>
    %181 = vector.extract_strided_slice %179 {offsets = [0, 128], sizes = [2, 32], strides = [1, 1]} : vector<2x256xf32> to vector<2x32xf32>
    %182 = vector.extract_strided_slice %169 {offsets = [0, 256], sizes = [2, 32], strides = [1, 1]} : vector<2x384xf32> to vector<2x32xf32>
    %183 = vector.extract_strided_slice %171 {offsets = [0, 256], sizes = [2, 32], strides = [1, 1]} : vector<2x384xf32> to vector<2x32xf32>
    %184 = vector.broadcast %12 : vector<1x32xf32> to vector<2x32xf32>
    %185 = arith.addf %183, %184 : vector<2x32xf32>
    %186 = arith.mulf %180, %185 : vector<2x32xf32>
    %187 = arith.addf %182, %186 : vector<2x32xf32>
    %188 = math.tanh %187 : vector<2x32xf32>
    %cst_31 = arith.constant 1.000000e+00 : f32
    %189 = vector.broadcast %cst_31 : f32 to vector<2x32xf32>
    %190 = arith.subf %189, %181 : vector<2x32xf32>
    %191 = arith.mulf %190, %188 : vector<2x32xf32>
    %192 = arith.mulf %181, %168 : vector<2x32xf32>
    %193 = arith.addf %191, %192 : vector<2x32xf32>
    %194 = vector.extract_strided_slice %17 {offsets = [14, 0], sizes = [2, 384], strides = [1, 1]} : vector<16x384xf32> to vector<2x384xf32>
    %195 = arith.truncf %193 : vector<2x32xf32> to vector<2x32xbf16>
    %cst_32 = arith.constant dense<0.000000e+00> : vector<2x384xf32>
    %196 = tpu.matmul %195, %10, %cst_32 {dimension_numbers = #tpu.dot_dimension_numbers<[1], [0], [0], [1], [0, 0, 1, 1], [], []>} : vector<2x32xbf16>, vector<32x384xbf16>, vector<2x384xf32> -> vector<2x384xf32>
    %197 = vector.extract_strided_slice %194 {offsets = [0, 0], sizes = [2, 256], strides = [1, 1]} : vector<2x384xf32> to vector<2x256xf32>
    %198 = vector.extract_strided_slice %196 {offsets = [0, 0], sizes = [2, 256], strides = [1, 1]} : vector<2x384xf32> to vector<2x256xf32>
    %199 = arith.addf %197, %198 : vector<2x256xf32>
    %200 = arith.negf %199 : vector<2x256xf32>
    %201 = math.exp %200 : vector<2x256xf32>
    %cst_33 = arith.constant 1.000000e+00 : f32
    %202 = vector.broadcast %cst_33 : f32 to vector<2x256xf32>
    %203 = arith.addf %202, %201 : vector<2x256xf32>
    %204 = arith.divf %202, %203 : vector<2x256xf32>
    %205 = vector.extract_strided_slice %204 {offsets = [0, 0], sizes = [2, 32], strides = [1, 1]} : vector<2x256xf32> to vector<2x32xf32>
    %206 = vector.extract_strided_slice %204 {offsets = [0, 128], sizes = [2, 32], strides = [1, 1]} : vector<2x256xf32> to vector<2x32xf32>
    %207 = vector.extract_strided_slice %194 {offsets = [0, 256], sizes = [2, 32], strides = [1, 1]} : vector<2x384xf32> to vector<2x32xf32>
    %208 = vector.extract_strided_slice %196 {offsets = [0, 256], sizes = [2, 32], strides = [1, 1]} : vector<2x384xf32> to vector<2x32xf32>
    %209 = vector.broadcast %12 : vector<1x32xf32> to vector<2x32xf32>
    %210 = arith.addf %208, %209 : vector<2x32xf32>
    %211 = arith.mulf %205, %210 : vector<2x32xf32>
    %212 = arith.addf %207, %211 : vector<2x32xf32>
    %213 = math.tanh %212 : vector<2x32xf32>
    %cst_34 = arith.constant 1.000000e+00 : f32
    %214 = vector.broadcast %cst_34 : f32 to vector<2x32xf32>
    %215 = arith.subf %214, %206 : vector<2x32xf32>
    %216 = arith.mulf %215, %213 : vector<2x32xf32>
    %217 = arith.mulf %206, %193 : vector<2x32xf32>
    %218 = arith.addf %216, %217 : vector<2x32xf32>
    %c0_35 = arith.constant 0 : index
    %c768 = arith.constant 768 : index
    %219 = vector.load %arg4[%c0_35, %c768] : memref<64x1536xbf16, #tpu.memory_space<vmem>>, vector<32x128xbf16>
    %c0_36 = arith.constant 0 : index
    %c896 = arith.constant 896 : index
    %220 = vector.load %arg4[%c0_36, %c896] : memref<64x1536xbf16, #tpu.memory_space<vmem>>, vector<32x128xbf16>
    %c0_37 = arith.constant 0 : index
    %c1024 = arith.constant 1024 : index
    %221 = vector.load %arg4[%c0_37, %c1024] : memref<64x1536xbf16, #tpu.memory_space<vmem>>, vector<32x128xbf16>
    %c0_38 = arith.constant 0 : index
    %c1152 = arith.constant 1152 : index
    %222 = vector.load %arg4[%c0_38, %c1152] : memref<64x1536xbf16, #tpu.memory_space<vmem>>, vector<32x128xbf16>
    %c0_39 = arith.constant 0 : index
    %c1280 = arith.constant 1280 : index
    %223 = vector.load %arg4[%c0_39, %c1280] : memref<64x1536xbf16, #tpu.memory_space<vmem>>, vector<32x128xbf16>
    %c0_40 = arith.constant 0 : index
    %c1408 = arith.constant 1408 : index
    %224 = vector.load %arg4[%c0_40, %c1408] : memref<64x1536xbf16, #tpu.memory_space<vmem>>, vector<64x128xbf16>
    %c2 = arith.constant 2 : index
    %c0_41 = arith.constant 0 : index
    %225 = vector.load %arg5[%c2, %c0_41] : memref<8x384xf32, #tpu.memory_space<vmem>>, vector<1x128xf32>
    %c2_42 = arith.constant 2 : index
    %c128 = arith.constant 128 : index
    %226 = vector.load %arg5[%c2_42, %c128] : memref<8x384xf32, #tpu.memory_space<vmem>>, vector<1x128xf32>
    %c2_43 = arith.constant 2 : index
    %c256 = arith.constant 256 : index
    %227 = vector.load %arg5[%c2_43, %c256] : memref<8x384xf32, #tpu.memory_space<vmem>>, vector<1x128xf32>
    %c3 = arith.constant 3 : index
    %c0_44 = arith.constant 0 : index
    %228 = vector.load %arg5[%c3, %c0_44] : memref<8x384xf32, #tpu.memory_space<vmem>>, vector<1x128xf32>
    %c3_45 = arith.constant 3 : index
    %c128_46 = arith.constant 128 : index
    %229 = vector.load %arg5[%c3_45, %c128_46] : memref<8x384xf32, #tpu.memory_space<vmem>>, vector<1x128xf32>
    %c3_47 = arith.constant 3 : index
    %c256_48 = arith.constant 256 : index
    %230 = vector.load %arg5[%c3_47, %c256_48] : memref<8x384xf32, #tpu.memory_space<vmem>>, vector<1x128xf32>
    %c4 = arith.constant 4 : index
    %c0_49 = arith.constant 0 : index
    %231 = vector.load %arg5[%c4, %c0_49] : memref<8x384xf32, #tpu.memory_space<vmem>>, vector<1x128xf32>
    %c4_50 = arith.constant 4 : index
    %c128_51 = arith.constant 128 : index
    %232 = vector.load %arg5[%c4_50, %c128_51] : memref<8x384xf32, #tpu.memory_space<vmem>>, vector<1x1xf32>
    %c0_52 = arith.constant 0 : index
    %c0_53 = arith.constant 0 : index
    %c0_54 = arith.constant 0 : index
    %233 = vector.load %arg1[%c0_52, %c0_53, %c0_54] : memref<2x8x32xf32, #tpu.memory_space<vmem>>, vector<2x8x32xf32>
    %234 = vector.shape_cast %233 : vector<2x8x32xf32> to vector<16x32xf32>
    %235 = arith.truncf %234 : vector<16x32xf32> to vector<16x32xbf16>
    %cst_55 = arith.constant dense<0.000000e+00> : vector<16x128xf32>
    %236 = tpu.matmul %235, %219, %cst_55 {dimension_numbers = #tpu.dot_dimension_numbers<[1], [0], [0], [1], [0, 0, 1, 1], [], []>} : vector<16x32xbf16>, vector<32x128xbf16>, vector<16x128xf32> -> vector<16x128xf32>
    %237 = vector.broadcast %225 : vector<1x128xf32> to vector<16x128xf32>
    %238 = arith.addf %236, %237 : vector<16x128xf32>
    %cst_56 = arith.constant 0.000000e+00 : f32
    %239 = vector.broadcast %cst_56 : f32 to vector<16x128xf32>
    %240 = arith.maximumf %238, %239 : vector<16x128xf32>
    %241 = arith.truncf %218 : vector<2x32xf32> to vector<2x32xbf16>
    %cst_57 = arith.constant dense<0.000000e+00> : vector<2x128xf32>
    %242 = tpu.matmul %241, %220, %cst_57 {dimension_numbers = #tpu.dot_dimension_numbers<[1], [0], [0], [1], [0, 0, 1, 1], [], []>} : vector<2x32xbf16>, vector<32x128xbf16>, vector<2x128xf32> -> vector<2x128xf32>
    %243 = vector.broadcast %226 : vector<1x128xf32> to vector<2x128xf32>
    %244 = arith.addf %242, %243 : vector<2x128xf32>
    %cst_58 = arith.constant 0.000000e+00 : f32
    %245 = vector.broadcast %cst_58 : f32 to vector<2x128xf32>
    %246 = arith.maximumf %244, %245 : vector<2x128xf32>
    %247 = vector.shape_cast %240 : vector<16x128xf32> to vector<2x8x128xf32>
    %248 = vector.shape_cast %246 : vector<2x128xf32> to vector<2x1x128xf32>
    %249 = vector.broadcast %248 : vector<2x1x128xf32> to vector<2x8x128xf32>
    %250 = arith.mulf %247, %249 : vector<2x8x128xf32>
    %251 = vector.shape_cast %231 : vector<1x128xf32> to vector<1x1x128xf32>
    %252 = vector.broadcast %251 : vector<1x1x128xf32> to vector<2x8x128xf32>
    %253 = arith.mulf %250, %252 : vector<2x8x128xf32>
    %cst_59 = arith.constant dense<0.000000e+00> : vector<2x8xf32>
    %254 = vector.multi_reduction <add>, %253, %cst_59 [2] : vector<2x8x128xf32> to vector<2x8xf32>
    %255 = vector.broadcast %232 : vector<1x1xf32> to vector<2x8xf32>
    %256 = arith.addf %254, %255 : vector<2x8xf32>
    %cst_60 = arith.constant 1.000000e+00 : f32
    %257 = vector.broadcast %cst_60 : f32 to vector<2x8xf32>
    %258 = arith.subf %257, %256 : vector<2x8xf32>
    %259 = vector.shape_cast %256 : vector<2x8xf32> to vector<1x2x8xf32>
    %cst_61 = arith.constant dense<0xFF800000> : vector<1xf32>
    %260 = vector.multi_reduction <maximumf>, %259, %cst_61 [1, 2] : vector<1x2x8xf32> to vector<1xf32>
    %261 = vector.shape_cast %260 : vector<1xf32> to vector<1x1x1xf32>
    %262 = vector.extract %261[0, 0, 0] : f32 from vector<1x1x1xf32>
    %263 = vector.broadcast %262 : f32 to vector<2x8xf32>
    %264 = arith.subf %256, %263 : vector<2x8xf32>
    %265 = math.exp %264 : vector<2x8xf32>
    %c0_62 = arith.constant 0 : index
    %c0_63 = arith.constant 0 : index
    %266 = vector.load %arg2[%c0_62, %c0_63] : memref<2x8xf32, #tpu.memory_space<vmem>>, vector<2x8xf32>
    %267 = arith.mulf %265, %266 : vector<2x8xf32>
    %cst_64 = arith.constant dense<0.000000e+00> : vector<2xf32>
    %268 = vector.multi_reduction <add>, %267, %cst_64 [1] : vector<2x8xf32> to vector<2xf32>
    %269 = vector.shape_cast %268 : vector<2xf32> to vector<2x1xf32>
    %cst_65 = arith.constant 9.99999974E-6 : f32
    %270 = vector.broadcast %cst_65 : f32 to vector<2x1xf32>
    %271 = arith.addf %269, %270 : vector<2x1xf32>
    %272 = vector.broadcast %271 : vector<2x1xf32> to vector<2x8xf32>
    %273 = arith.divf %267, %272 : vector<2x8xf32>
    %274 = vector.shape_cast %273 : vector<2x8xf32> to vector<2x8x1xf32>
    %275 = vector.broadcast %274 : vector<2x8x1xf32> to vector<2x8x32xf32>
    %276 = arith.mulf %275, %233 : vector<2x8x32xf32>
    %cst_66 = arith.constant dense<0.000000e+00> : vector<2x32xf32>
    %277 = vector.multi_reduction <add>, %276, %cst_66 [1] : vector<2x8x32xf32> to vector<2x32xf32>
    %278 = arith.truncf %218 : vector<2x32xf32> to vector<2x32xbf16>
    %cst_67 = arith.constant dense<0.000000e+00> : vector<2x128xf32>
    %279 = tpu.matmul %278, %221, %cst_67 {dimension_numbers = #tpu.dot_dimension_numbers<[1], [0], [0], [1], [0, 0, 1, 1], [], []>} : vector<2x32xbf16>, vector<32x128xbf16>, vector<2x128xf32> -> vector<2x128xf32>
    %280 = vector.broadcast %227 : vector<1x128xf32> to vector<2x128xf32>
    %281 = arith.addf %279, %280 : vector<2x128xf32>
    %cst_68 = arith.constant 0.000000e+00 : f32
    %282 = vector.broadcast %cst_68 : f32 to vector<2x128xf32>
    %283 = arith.maximumf %281, %282 : vector<2x128xf32>
    %284 = arith.truncf %277 : vector<2x32xf32> to vector<2x32xbf16>
    %cst_69 = arith.constant dense<0.000000e+00> : vector<2x128xf32>
    %285 = tpu.matmul %284, %222, %cst_69 {dimension_numbers = #tpu.dot_dimension_numbers<[1], [0], [0], [1], [0, 0, 1, 1], [], []>} : vector<2x32xbf16>, vector<32x128xbf16>, vector<2x128xf32> -> vector<2x128xf32>
    %286 = vector.broadcast %228 : vector<1x128xf32> to vector<2x128xf32>
    %287 = arith.addf %285, %286 : vector<2x128xf32>
    %cst_70 = arith.constant 0.000000e+00 : f32
    %288 = vector.broadcast %cst_70 : f32 to vector<2x128xf32>
    %289 = arith.maximumf %287, %288 : vector<2x128xf32>
    %290 = arith.mulf %289, %283 : vector<2x128xf32>
    %291 = vector.extract_strided_slice %290 {offsets = [0, 0], sizes = [2, 32], strides = [1, 1]} : vector<2x128xf32> to vector<2x32xf32>
    %292 = arith.truncf %291 : vector<2x32xf32> to vector<2x32xbf16>
    %cst_71 = arith.constant dense<0.000000e+00> : vector<2x128xf32>
    %293 = tpu.matmul %292, %223, %cst_71 {dimension_numbers = #tpu.dot_dimension_numbers<[1], [0], [0], [1], [0, 0, 1, 1], [], []>} : vector<2x32xbf16>, vector<32x128xbf16>, vector<2x128xf32> -> vector<2x128xf32>
    %294 = vector.broadcast %229 : vector<1x128xf32> to vector<2x128xf32>
    %295 = arith.addf %293, %294 : vector<2x128xf32>
    %cst_72 = arith.constant 0.000000e+00 : f32
    %296 = vector.broadcast %cst_72 : f32 to vector<2x128xf32>
    %297 = arith.maximumf %295, %296 : vector<2x128xf32>
    %298 = vector.extract_strided_slice %297 {offsets = [0, 0], sizes = [2, 64], strides = [1, 1]} : vector<2x128xf32> to vector<2x64xf32>
    %299 = arith.truncf %298 : vector<2x64xf32> to vector<2x64xbf16>
    %cst_73 = arith.constant dense<0.000000e+00> : vector<2x128xf32>
    %300 = tpu.matmul %299, %224, %cst_73 {dimension_numbers = #tpu.dot_dimension_numbers<[1], [0], [0], [1], [0, 0, 1, 1], [], []>} : vector<2x64xbf16>, vector<64x128xbf16>, vector<2x128xf32> -> vector<2x128xf32>
    %301 = vector.broadcast %230 : vector<1x128xf32> to vector<2x128xf32>
    %302 = arith.addf %300, %301 : vector<2x128xf32>
    %cst_74 = arith.constant 0.000000e+00 : f32
    %303 = vector.broadcast %cst_74 : f32 to vector<24x128xf32>
    %c0_75 = arith.constant 0 : index
    %c0_76 = arith.constant 0 : index
    %304 = vector.load %arg6[%c0_75, %c0_76] : memref<24x128xf32, #tpu.memory_space<vmem>>, vector<24x128xf32>
    tpu.vector_store %arg6[%c0_75, %c0_76], %303 {strides = array<i32>} : memref<24x128xf32, #tpu.memory_space<vmem>>, vector<24x128xf32>,
    %c0_77 = arith.constant 0 : index
    %c0_78 = arith.constant 0 : index
    %305 = vector.load %arg6[%c0_77, %c0_78] : memref<24x128xf32, #tpu.memory_space<vmem>>, vector<16x128xf32>
    tpu.vector_store %arg6[%c0_77, %c0_78], %8 {strides = array<i32>} : memref<24x128xf32, #tpu.memory_space<vmem>>, vector<16x128xf32>,
    %c16 = arith.constant 16 : index
    %c0_79 = arith.constant 0 : index
    %306 = vector.load %arg6[%c16, %c0_79] : memref<24x128xf32, #tpu.memory_space<vmem>>, vector<2x128xf32>
    tpu.vector_store %arg6[%c16, %c0_79], %302 {strides = array<i32>} : memref<24x128xf32, #tpu.memory_space<vmem>>, vector<2x128xf32>,
    %c18 = arith.constant 18 : index
    %c0_80 = arith.constant 0 : index
    %307 = vector.load %arg6[%c18, %c0_80] : memref<24x128xf32, #tpu.memory_space<vmem>>, vector<2x8xf32>
    tpu.vector_store %arg6[%c18, %c0_80], %273 {strides = array<i32>} : memref<24x128xf32, #tpu.memory_space<vmem>>, vector<2x8xf32>,
    %c20 = arith.constant 20 : index
    %c0_81 = arith.constant 0 : index
    %308 = vector.load %arg6[%c20, %c0_81] : memref<24x128xf32, #tpu.memory_space<vmem>>, vector<2x8xf32>
    tpu.vector_store %arg6[%c20, %c0_81], %258 {strides = array<i32>} : memref<24x128xf32, #tpu.memory_space<vmem>>, vector<2x8xf32>,
    return
  }
}

</mosaic_0001>

<bundles_post_ra>
// kernel: base_model_forward.1
= control target key start
LH: loop header
LB: loop body
LE: loop exit
PB: predicated region body
PF: predicated region fallthrough
CT: control target
= control target key end

     0   :  { %11 = vsyncpa [#allocation3], 0  ;;  %s2285_s21 = smov [#allocation2]   ;;  %s2688_s0 = inlined_call_operand.vmem [shape: s32[32,1], index: 0, kind: input, shape index: {}]   ;;  %s2689_s1 = inlined_call_operand.vmem [shape: f32[2,8,32], index: 1, kind: input, shape index: {}]   ;;  %s2690_s2 = inlined_call_operand.vmem [shape: f32[2,8], index: 2, kind: input, shape index: {}]   ;;  %s2691_s3 = inlined_call_operand.vmem [shape: f32[32,128], index: 3, kind: input, shape index: {}]   ;;  %s2692_s4 = inlined_call_operand.hbm [shape: bf16[64,1536], index: 4, kind: input, shape index: {}]   ;;  %s2693_s5 = inlined_call_operand.vmem [shape: f32[8,384], index: 5, kind: input, shape index: {}]   ;;  %s2694_s6 = inlined_call_operand.vmem [shape: f32[24,128], index: 6, kind: output, shape index: {}]  }
   0x1   :  { %s25_s22 = sshll.u32 %s2285_s21, 4  ;;  %s2261_s25 = scalar_lea.hbm %s2692_s4, 6144  ;;  %s26_s22 = int_to_ptr.vmem [resolvable:$true] %s25_s22 }
   0x2   :  { %p2262_p0 = scmp.ne.s32.totalorder %s2692_s4, %s2261_s25  ;;  %p2265_p1 = scmp.lt.u32.totalorder %s2261_s25, %s2692_s4 }
   0x4   :  { %p2267_p2 = pnand %p2265_p1, %p2262_p0 }
   0x6   :  { %2270 = shalt.err (!%p2267_p2)
}
   0x7   :  { %s2271_s30 = scalar_lea.vmem %s26_s22, 6144  ;;  %p2276_p4 = scmp.lt.s32.totalorder %s26_s22, %s26_s22 }
   0x8   :  { %p2272_p3 = scmp.ne.s32.totalorder %s26_s22, %s2271_s30  ;;  %p2277_p5 = scmp.lt.s32.totalorder %s2271_s30, %s2271_s30 }
   0xa   :  { %p2278_p6 = por %p2277_p5, %p2276_p4 }
   0xc   :  { %p2279_p7 = pnand %p2278_p6, %p2272_p3 }
   0xe   :  { %2282 = shalt.err (!%p2279_p7)
}
   0xf   :  { %s2286_s7 = smov 768   ;;  %s2287_s8 = smov 48  }
  0x10   :  { %31 = dma.hbm_to_vmem [thread:$0]  %s2692_s4, 6144, %s26_s22, [#allocation3], %s2286_s7, %s2286_s7, %s2287_s8  }
  0x11   :  { %2283 = dma.done.wait [#allocation3], 6144  }
  0x12   :  { %2284 = vsyncadd [#allocation3], 4294961152  ;;  %v2288_v0 = vmov 0   ;;  %v2289_v1 = vmov 0.0   ;;  %v40_v2 = vld [vmem:[%s2688_s0 + $0x10] sm:$0xff]  ;;  %v38_v3 = vld [vmem:[%s2688_s0] sm:$0xff]  ;;  %v42_v15 = vlaneseq }
  0x13   :  { %2141 = vset.pattern.permute.xlu1 %v2288_v0  ;;  %2140 = vset.pattern.permute.xlu0 %v2288_v0  ;;  %1832 = vst [vmem:[%s2694_s6 + $0x10] sm:$0xff] %v2289_v1  ;;  %v41_v4 = vld [vmem:[%s2688_s0 + $0x18] sm:$0xff]  ;;  %v39_v5 = vld [vmem:[%s2688_s0 + $0x8] sm:$0xff]  ;;  %v68_v6 = vld [vmem:[%s2691_s3] sm:$0xff]  ;;  %vm2290_vm0 = vmmov 0   ;;  %vm72_vm1 = vcmask 261120  }
  0x14   :  { %1999 = vmatprep.subr.bf16.mxu0 %v2289_v1  ;;  %51 = vperm.xlu1 %2141, %v40_v2   ;;  %v69_v7 = vld [vmem:[%s2691_s3 + $0x8] sm:$0xff]  ;;  %v70_v9 = vld [vmem:[%s2691_s3 + $0x10] sm:$0xff]  ;;  %v71_v10 = vld [vmem:[%s2691_s3 + $0x18] sm:$0xff]  ;;  %v2374_v16 = vand.u32 127, %v42_v15  ;;  %v2426_v35 = vshrl.u32 %v42_v15, 7  ;;  %vm1537_vm6 = vcmask 1041409  }
  0x15   :  { %45 = vperm.xlu0 %2140, %v38_v3   ;;  %v2123_v8 = vpack.c.bf16 %v69_v7, %v68_v6  ;;  %v2127_v11 = vpack.c.bf16 %v71_v10, %v70_v9  ;;  %v2142_v12 = vld [vmem:[#allocation2 + $0x8] ss:$48 sps:$4 sm:$0xff]   ;;  %v2145_v13 = vld [vmem:[#allocation2 + $0x4] ss:$48 sps:$4 sm:$0xff]   ;;  %2003 = vmatprep.mubr.msk.bf16.mxu0 %vm2290_vm0, %v2289_v1  ;;  %v2143_v23 = vld [vmem:[#allocation2] ss:$48 sps:$4 sm:$0xff]  }
  0x16   :  { %v2146_v14 = vld [vmem:[#allocation2 + $0x68] ss:$48 sps:$4 sm:$0xff]   ;;  %2000 = vmatpush3.bf16.msra.mxu0 %v2142_v12  ;;  %v2149_v24 = vld [vmem:[#allocation2 + $0x64] ss:$48 sps:$4 sm:$0xff]   ;;  %v2147_v29 = vld [vmem:[#allocation2 + $0x60] ss:$48 sps:$4 sm:$0xff]  }
  0x17   :  { %2124 = vmatprep.subr.bf16.mxu1 %v2123_v8  ;;  %2001 = vmatprep.subr.bf16.mxu0 %v2289_v1  ;;  %v2385_v27 = vld [vmem:[#allocation2 + $0x14] ss:$48 sps:$4 sm:$0xff]   ;;  %v2390_v30 = vld [vmem:[#allocation2 + $0x10] ss:$48 sps:$4 sm:$0xff]   ;;  %v2398_v32 = vld [vmem:[#allocation2 + $0xc] ss:$48 sps:$4 sm:$0xff]  }
  0x18   :  { %54 = vperm.xlu1 %2141, %v41_v4   ;;  %2126 = vmatpush3.bf16.msra.mxu1 %v2123_v8  ;;  %v2393_v31 = vld [vmem:[#allocation2 + $0x74] ss:$48 sps:$4 sm:$0xff]   ;;  %v2401_v33 = vld [vmem:[#allocation2 + $0x70] ss:$48 sps:$4 sm:$0xff]   ;;  %v2407_v34 = vld [vmem:[#allocation2 + $0x6c] ss:$48 sps:$4 sm:$0xff]  }
  0x19   :  { %48 = vperm.xlu0 %2140, %v39_v5   ;;  %2128 = vmatprep.subr.bf16.mxu1 %v2127_v11  ;;  %v184_v36 = vsub.s32 2, %v2426_v35  ;;  %v170_v37 = vld [vmem:[%s2693_s5] ss:$8 sm:$0x7]  ;;  %v2441_v46 = vsub.s32 0, %v2426_v35  ;;  %v2444_v47 = vsub.s32 1, %v2426_v35 }
  0x1a   :  { %2002 = vmatpush3.bf16.msra.mxu0 %v2146_v14  ;;  %vm1540_vm7 = vcmask 58368   ;;  %vm1786_vm8 = vcmask 523264  }
  0x1b   :  { %2007 = vmatprep.subr.bf16.mxu0 %v2289_v1  ;;  %v185_v40 = vrot.slane %v170_v37, %v184_v36  ;;  %v177_v49 = vrot.slane %v170_v37, %v2441_v46  ;;  %v181_v51 = vrot.slane %v170_v37, %v2444_v47 }
  0x1c   :  { %2130 = vmatpush3.bf16.msra.mxu1 %v2127_v11  ;;  %v2461_v11 = vld [vmem:[%s2693_s5 + $0x1] ss:$0 sm:$0xff] }
  0x1d   :  { %224 = vmatprep.subr.bf16.mxu1 %v2145_v13 }
  0x93   :  { %v52_v17 = vpop.permute.xlu1 %51 }
  0x94   :  { %v46_v18 = vpop.permute.xlu0 %45  ;;  %vm58_vm2 = vcmp.eq.s32.totalorder %v52_v17, %v2374_v16 }
  0x95   :  { %vm56_vm3 = vcmp.eq.s32.totalorder %v46_v18, %v2374_v16  ;;  %v1867_v20 = vsel %vm58_vm2, 1.0, %v2289_v1 }
  0x96   :  { %v1865_v19 = vsel %vm56_vm3, 1.0, %v2289_v1 }
  0x97   :  { %1996 = vmatprep.mubr.msk.f32.mxu1 %vm72_vm1, %v1865_v19  ;;  %v55_v21 = vpop.permute.xlu1 %54 }
  0x98   :  { %v49_v22 = vpop.permute.xlu0 %48  ;;  %vm59_vm4 = vcmp.eq.s32.totalorder %v55_v21, %v2374_v16 }
  0x99   :  { %vm57_vm5 = vcmp.eq.s32.totalorder %v49_v22, %v2374_v16  ;;  %v1868_v25 = vsel %vm59_vm4, 1.0, %v2289_v1 }
  0x9a   :  { %v1866_v26 = vsel %vm57_vm5, 1.0, %v2289_v1  ;;  %v172_v28 = vpack.c.bf16 %v1868_v25, %v1867_v20 }
  0x9b   :  { %1997 = vmatmul.mubr.msk.f32.vlgmr.msra.gmra.mrb[0].mxu1 %vm72_vm1, %v1866_v26 }
  0x9c   :  { %225 = vmatpush1.bf16.msra.mxu1 %v2143_v23  ;;  %256 = vmatprep.mubr.bf16.mxu1 %v2288_v0 }
  0x9d   :  { %2004 = vmatmul.mubr.msk.bf16.vlgmr.msra.gmra.mrb[0].mxu0 %vm72_vm1, %v172_v28  ;;  %226 = vmatprep.subr.bf16.mxu1 %v2149_v24 }
  0x9e   :  { %2008 = vmatpush3.bf16.msra.mxu0 %v2385_v27  ;;  %2011 = vmatprep.mubr.msk.bf16.mxu0 %vm2290_vm0, %v2289_v1 }
  0x9f   :  { %2009 = vmatprep.subr.bf16.mxu0 %v2289_v1 }
  0xa0   :  { %227 = vmatpush1.bf16.msra.mxu1 %v2147_v29 }
  0xa1   :  { %343 = vmatprep.subr.bf16.mxu1 %v2390_v30 }
  0xa2   :  { %2010 = vmatpush3.bf16.msra.mxu0 %v2393_v31 }
  0xa3   :  { %1877 = vmatmul.mubr.msk.bf16.vlgmr.msra.gmra.mrb[4].mxu1 %vm72_vm1, %v172_v28  ;;  %2015 = vmatprep.subr.bf16.mxu0 %v2289_v1 }
  0xa4   :  { %344 = vmatpush1.bf16.msra.mxu1 %v2398_v32  ;;  %375 = vmatprep.mubr.bf16.mxu1 %v2288_v0 }
  0xa5   :  { %345 = vmatprep.subr.bf16.mxu1 %v2401_v33  ;;  %2012 = vmatmul.mubr.bf16.vlgmr.msra.gmra.mrb[4].mxu0 %v2288_v0 }
  0xa6   :  { %2016 = vmatpush3.bf16.msra.mxu0 %v2385_v27  ;;  %2019 = vmatprep.mubr.msk.bf16.mxu0 %vm2290_vm0, %v2289_v1 }
  0xa7   :  { %2017 = vmatprep.subr.bf16.mxu0 %v2289_v1 }
  0xa8   :  { %346 = vmatpush1.bf16.msra.mxu1 %v2407_v34 }
  0xa9   :  { %450 = vmatprep.subr.bf16.mxu1 %v2390_v30 }
  0xaa   :  { %2018 = vmatpush3.bf16.msra.mxu0 %v2393_v31 }
  0xab   :  { %376 = vmatmul.mubr.bf16.vlgmr.msra.gmra.mrb[8].mxu1 %v2288_v0  ;;  %2023 = vmatprep.subr.bf16.mxu0 %v2289_v1 }
  0xac   :  { %451 = vmatpush1.bf16.msra.mxu1 %v2398_v32  ;;  %482 = vmatprep.mubr.bf16.mxu1 %v2288_v0 }
  0xad   :  { %452 = vmatprep.subr.bf16.mxu1 %v2401_v33 }
  0xb0   :  { %453 = vmatpush1.bf16.msra.mxu1 %v2407_v34 }
  0xb1   :  { %571 = vmatprep.subr.bf16.mxu1 %v2390_v30 }
 0x16e   :  { %v1998_v38 = vpop.f32.mrb[0].mxu1 }
 0x16f   :  { %1834 = vst [vmem:[%s2694_s6 + $0x8] sm:$0xff] %v1998_v38  ;;  %v145_v39 = vpop.f32.mrb[1].mxu1 }
 0x170   :  { %1833 = vst [vmem:[%s2694_s6] sm:$0xff] %v145_v39  ;;  %v301_v41 = vpop.f32.mrb[0].mxu0 }
 0x171   :  { %v2005_v42 = vpop.f32.mrb[1].mxu0  ;;  %v2464_v15 = vadd.f32 %v301_v41, %v185_v40 }
 0x172   :  { %v304_v43 = vpop.f32.mrb[2].mxu0 }
 0x173   :  { %v2438_v44 = vadd.f32 %v304_v43, %v185_v40  ;;  %v2006_v45 = vpop.f32.mrb[3].mxu0 }
 0x176   :  { %v258_v48 = vpop.f32.mrb[4].mxu1 }
 0x177   :  { %v260_v50 = vpop.f32.mrb[5].mxu1  ;;  %v2452_v60 = vadd.f32 %v258_v48, %v177_v49 }
 0x178   :  { %v262_v52 = vpop.f32.mrb[6].mxu1  ;;  %v418_v53 = vpop.f32.mrb[4].mxu0  ;;  %v2455_v2 = vadd.f32 %v260_v50, %v181_v51 }
 0x179   :  { %v2448_v54 = vadd.f32 %v262_v52, %v177_v49  ;;  %v264_v55 = vpop.f32.mrb[7].mxu1  ;;  %v2013_v56 = vpop.f32.mrb[5].mxu0  ;;  %v438_v13 = vadd.f32 %v418_v53, %v2461_v11 }
 0x17a   :  { %v2450_v57 = vadd.f32 %v264_v55, %v181_v51  ;;  %v421_v58 = vpop.f32.mrb[6].mxu0 }
 0x17b   :  { %v2014_v59 = vpop.f32.mrb[7].mxu0 }
 0x17e   :  { %v377_v61 = vpop.f32.mrb[8].mxu1 }
 0x17f   :  { %v424_v62 = vadd.f32 %v377_v61, %v2452_v60  ;;  %v379_v63 = vpop.f32.mrb[9].mxu1 }
 0x180   :  { %v381_v3 = vpop.f32.mrb[10].mxu1  ;;  %v425_v6 = vadd.f32 %v379_v63, %v2455_v2 }
 0x181   :  { %v1885_v4 = vmul.f32 -1.442695, %v424_v62  ;;  %v382_v5 = vpop.f32.mrb[11].mxu1 }
 0x182   :  { %v1886_v7 = vmul.f32 -1.442695, %v425_v6 }
 0x183   :  { %2172 = vpow2.f32 %v1885_v4 }
 0x184   :  { %2174 = vpow2.f32 %v1886_v7 }
 0x18d   :  { %v2173_v8 = vpop.eup %2172 }
 0x18e   :  { %v432_v9 = vadd.f32 1.0, %v2173_v8  ;;  %v2175_v10 = vpop.eup %2174 }
 0x18f   :  { %v433_v12 = vadd.f32 1.0, %v2175_v10 }
 0x190   :  { %2176 = vrcp.f32 %v432_v9 }
 0x191   :  { %2178 = vrcp.f32 %v433_v12 }
 0x19a   :  { %v2177_v14 = vpop.eup %2176 }
 0x19b   :  { %v439_v17 = vmul.f32 %v2177_v14, %v438_v13  ;;  %v2179_v19 = vpop.eup %2178 }
 0x19c   :  { %v442_v20 = vsub.f32 1.0, %v2179_v19  ;;  %v444_v22 = vmul.f32 0.0, %v2179_v19 }
 0x19d   :  { %v440_v18 = vadd.f32 %v439_v17, %v2464_v15 }
 0x19f   :  { %2180 = vtanh.f32 %v440_v18 }
 0x1a9   :  { %v2181_v21 = vpop.eup %2180 }
 0x1aa   :  { %v443_v23 = vmul.f32 %v2181_v21, %v442_v20 }
 0x1ac   :  { %v445_v24 = vadd.f32 %v444_v22, %v443_v23 }
 0x1ae   :  { %v446_v25 = vpack.c.bf16 %v445_v24, %v445_v24  ;;  %v561_v59 = vrot.slane %v445_v24, 6 }
 0x1b0   :  { %1887 = vmatmul.mubr.msk.bf16.vlgmr.msra.gmra.mrb[12].mxu1 %vm72_vm1, %v446_v25  ;;  %2020 = vmatmul.mubr.msk.bf16.vlgmr.msra.gmra.mrb[8].mxu0 %vm72_vm1, %v446_v25 }
 0x1b1   :  { %572 = vmatpush1.bf16.msra.mxu1 %v2398_v32  ;;  %2024 = vmatpush3.bf16.msra.mxu0 %v2385_v27 }
 0x1b2   :  { %573 = vmatprep.subr.bf16.mxu1 %v2401_v33  ;;  %2025 = vmatprep.subr.bf16.mxu0 %v2289_v1 }
 0x1b3   :  { %603 = vmatprep.mubr.bf16.mxu1 %v2288_v0  ;;  %2027 = vmatprep.mubr.msk.bf16.mxu0 %vm2290_vm0, %v2289_v1 }
 0x1b5   :  { %574 = vmatpush1.bf16.msra.mxu1 %v2407_v34  ;;  %2026 = vmatpush3.bf16.msra.mxu0 %v2393_v31 }
 0x1b6   :  { %692 = vmatprep.subr.bf16.mxu1 %v2390_v30  ;;  %2031 = vmatprep.subr.bf16.mxu0 %v2289_v1 }
 0x283   :  { %v484_v26 = vpop.f32.mrb[12].mxu1  ;;  %v525_v28 = vpop.f32.mrb[8].mxu0 }
 0x284   :  { %v533_v29 = vrot.slane %v484_v26, 6  ;;  %v486_v36 = vpop.f32.mrb[13].mxu1  ;;  %v2021_v37 = vpop.f32.mrb[9].mxu0  ;;  %v551_v55 = vadd.f32 %v525_v28, %v2461_v11 }
 0x285   :  { %v534_v38 = vrot.slane %v486_v36, 6  ;;  %v488_v39 = vpop.f32.mrb[14].mxu1  ;;  %v528_v40 = vpop.f32.mrb[10].mxu0 }
 0x286   :  { %v537_v41 = vadd.f32 %v533_v29, %v2452_v60  ;;  %v489_v42 = vpop.f32.mrb[15].mxu1  ;;  %v2022_v43 = vpop.f32.mrb[11].mxu0  ;;  %v553_v56 = vrot.slane %v551_v55, 6 }
 0x287   :  { %v538_v45 = vadd.f32 %v534_v38, %v2455_v2 }
 0x288   :  { %v1889_v48 = vmul.f32 -1.442695, %v537_v41 }
 0x289   :  { %v1890_v49 = vmul.f32 -1.442695, %v538_v45 }
 0x28a   :  { %2182 = vpow2.f32 %v1889_v48 }
 0x28b   :  { %2184 = vpow2.f32 %v1890_v49 }
 0x294   :  { %v2183_v50 = vpop.eup %2182 }
 0x295   :  { %v2185_v51 = vpop.eup %2184  ;;  %v545_v52 = vadd.f32 1.0, %v2183_v50 }
 0x296   :  { %v546_v53 = vadd.f32 1.0, %v2185_v51 }
 0x297   :  { %2186 = vrcp.f32 %v545_v52 }
 0x298   :  { %2188 = vrcp.f32 %v546_v53 }
 0x2a1   :  { %v2187_v58 = vpop.eup %2186 }
 0x2a2   :  { %v2189_v61 = vpop.eup %2188  ;;  %v555_v62 = vmul.f32 %v2187_v58, %v553_v56 }
 0x2a3   :  { %v563_v63 = vmul.f32 %v2189_v61, %v561_v59  ;;  %v558_v4 = vsub.f32 1.0, %v2189_v61 }
 0x2a4   :  { %v556_v3 = vadd.f32 %v555_v62, %v2464_v15 }
 0x2a6   :  { %2190 = vtanh.f32 %v556_v3 }
 0x2b0   :  { %v2191_v5 = vpop.eup %2190 }
 0x2b1   :  { %v559_v6 = vmul.f32 %v2191_v5, %v558_v4 }
 0x2b3   :  { %v564_v7 = vadd.f32 %v563_v63, %v559_v6 }
 0x2b5   :  { %v565_v8 = vpack.c.bf16 %v564_v7, %v564_v7  ;;  %v682_v41 = vrot.slane %v564_v7, 6 }
 0x2b7   :  { %v567_v9 = vrot.slane %v565_v8, 1 }
 0x2b9   :  { %1891 = vmatmul.mubr.msk.bf16.vlgmr.msra.gmra.mrb[16].mxu1 %vm72_vm1, %v567_v9  ;;  %2028 = vmatmul.mubr.msk.bf16.vlgmr.msra.gmra.mrb[12].mxu0 %vm72_vm1, %v567_v9 }
 0x2ba   :  { %693 = vmatpush1.bf16.msra.mxu1 %v2398_v32  ;;  %2032 = vmatpush3.bf16.msra.mxu0 %v2385_v27 }
 0x2bb   :  { %694 = vmatprep.subr.bf16.mxu1 %v2401_v33  ;;  %2033 = vmatprep.subr.bf16.mxu0 %v2289_v1 }
 0x2bc   :  { %724 = vmatprep.mubr.bf16.mxu1 %v2288_v0  ;;  %2035 = vmatprep.mubr.msk.bf16.mxu0 %vm2290_vm0, %v2289_v1 }
 0x2be   :  { %695 = vmatpush1.bf16.msra.mxu1 %v2407_v34  ;;  %2034 = vmatpush3.bf16.msra.mxu0 %v2393_v31 }
 0x2bf   :  { %813 = vmatprep.subr.bf16.mxu1 %v2390_v30  ;;  %2039 = vmatprep.subr.bf16.mxu0 %v2289_v1 }
 0x38c   :  { %v605_v10 = vpop.f32.mrb[16].mxu1  ;;  %v646_v12 = vpop.f32.mrb[12].mxu0 }
 0x38d   :  { %v654_v13 = vrot.slane %v605_v10, 4  ;;  %v607_v14 = vpop.f32.mrb[17].mxu1  ;;  %v2029_v17 = vpop.f32.mrb[13].mxu0  ;;  %v672_v38 = vadd.f32 %v646_v12, %v2461_v11 }
 0x38e   :  { %v655_v18 = vrot.slane %v607_v14, 4  ;;  %v609_v19 = vpop.f32.mrb[18].mxu1  ;;  %v649_v20 = vpop.f32.mrb[14].mxu0 }
 0x38f   :  { %v658_v21 = vadd.f32 %v654_v13, %v2452_v60  ;;  %v610_v22 = vpop.f32.mrb[19].mxu1  ;;  %v2030_v23 = vpop.f32.mrb[15].mxu0  ;;  %v674_v39 = vrot.slane %v672_v38, 4 }
 0x390   :  { %v659_v24 = vadd.f32 %v655_v18, %v2455_v2 }
 0x391   :  { %v1893_v25 = vmul.f32 -1.442695, %v658_v21 }
 0x392   :  { %v1894_v26 = vmul.f32 -1.442695, %v659_v24 }
 0x393   :  { %2192 = vpow2.f32 %v1893_v25 }
 0x394   :  { %2194 = vpow2.f32 %v1894_v26 }
 0x39d   :  { %v2193_v28 = vpop.eup %2192 }
 0x39e   :  { %v2195_v29 = vpop.eup %2194  ;;  %v666_v36 = vadd.f32 1.0, %v2193_v28 }
 0x39f   :  { %v667_v37 = vadd.f32 1.0, %v2195_v29 }
 0x3a0   :  { %2196 = vrcp.f32 %v666_v36 }
 0x3a1   :  { %2198 = vrcp.f32 %v667_v37 }
 0x3aa   :  { %v2197_v40 = vpop.eup %2196 }
 0x3ab   :  { %v2199_v42 = vpop.eup %2198  ;;  %v676_v43 = vmul.f32 %v2197_v40, %v674_v39 }
 0x3ac   :  { %v684_v45 = vmul.f32 %v2199_v42, %v682_v41  ;;  %v679_v49 = vsub.f32 1.0, %v2199_v42 }
 0x3ad   :  { %v677_v48 = vadd.f32 %v676_v43, %v2464_v15 }
 0x3af   :  { %2200 = vtanh.f32 %v677_v48 }
 0x3b9   :  { %v2201_v50 = vpop.eup %2200 }
 0x3ba   :  { %v680_v51 = vmul.f32 %v2201_v50, %v679_v49 }
 0x3bc   :  { %v685_v52 = vadd.f32 %v684_v45, %v680_v51 }
 0x3be   :  { %v686_v53 = vpack.c.bf16 %v685_v52, %v685_v52  ;;  %v803_v21 = vrot.slane %v685_v52, 6 }
 0x3c0   :  { %v688_v55 = vrot.slane %v686_v53, 2 }
 0x3c2   :  { %1895 = vmatmul.mubr.msk.bf16.vlgmr.msra.gmra.mrb[20].mxu1 %vm72_vm1, %v688_v55  ;;  %2036 = vmatmul.mubr.msk.bf16.vlgmr.msra.gmra.mrb[16].mxu0 %vm72_vm1, %v688_v55 }
 0x3c3   :  { %814 = vmatpush1.bf16.msra.mxu1 %v2398_v32  ;;  %2040 = vmatpush3.bf16.msra.mxu0 %v2385_v27 }
 0x3c4   :  { %815 = vmatprep.subr.bf16.mxu1 %v2401_v33  ;;  %2041 = vmatprep.subr.bf16.mxu0 %v2289_v1 }
 0x3c5   :  { %845 = vmatprep.mubr.bf16.mxu1 %v2288_v0  ;;  %2043 = vmatprep.mubr.msk.bf16.mxu0 %vm2290_vm0, %v2289_v1 }
 0x3c7   :  { %816 = vmatpush1.bf16.msra.mxu1 %v2407_v34  ;;  %2042 = vmatpush3.bf16.msra.mxu0 %v2393_v31 }
 0x3c8   :  { %923 = vmatprep.subr.bf16.mxu1 %v2390_v30  ;;  %2047 = vmatprep.subr.bf16.mxu0 %v2289_v1 }
 0x495   :  { %v726_v56 = vpop.f32.mrb[20].mxu1  ;;  %v767_v58 = vpop.f32.mrb[16].mxu0 }
 0x496   :  { %v775_v59 = vrot.slane %v726_v56, 2  ;;  %v728_v61 = vpop.f32.mrb[21].mxu1  ;;  %v2037_v62 = vpop.f32.mrb[17].mxu0  ;;  %v793_v18 = vadd.f32 %v767_v58, %v2461_v11 }
 0x497   :  { %v776_v63 = vrot.slane %v728_v61, 2  ;;  %v730_v3 = vpop.f32.mrb[22].mxu1  ;;  %v770_v4 = vpop.f32.mrb[18].mxu0 }
 0x498   :  { %v779_v5 = vadd.f32 %v775_v59, %v2452_v60  ;;  %v731_v6 = vpop.f32.mrb[23].mxu1  ;;  %v2038_v7 = vpop.f32.mrb[19].mxu0  ;;  %v795_v19 = vrot.slane %v793_v18, 2 }
 0x499   :  { %v780_v8 = vadd.f32 %v776_v63, %v2455_v2 }
 0x49a   :  { %v1897_v9 = vmul.f32 -1.442695, %v779_v5 }
 0x49b   :  { %v1898_v10 = vmul.f32 -1.442695, %v780_v8 }
 0x49c   :  { %2202 = vpow2.f32 %v1897_v9 }
 0x49d   :  { %2204 = vpow2.f32 %v1898_v10 }
 0x4a6   :  { %v2203_v12 = vpop.eup %2202 }
 0x4a7   :  { %v2205_v13 = vpop.eup %2204  ;;  %v787_v14 = vadd.f32 1.0, %v2203_v12 }
 0x4a8   :  { %v788_v17 = vadd.f32 1.0, %v2205_v13 }
 0x4a9   :  { %2206 = vrcp.f32 %v787_v14 }
 0x4aa   :  { %2208 = vrcp.f32 %v788_v17 }
 0x4b3   :  { %v2207_v20 = vpop.eup %2206 }
 0x4b4   :  { %v2209_v60 = vpop.eup %2208  ;;  %v797_v22 = vmul.f32 %v2207_v20, %v795_v19 }
 0x4b5   :  { %v805_v23 = vmul.f32 %v2209_v60, %v803_v21  ;;  %v800_v24 = vsub.f32 1.0, %v2209_v60 }
 0x4b6   :  { %v798_v2 = vadd.f32 %v797_v22, %v2464_v15 }
 0x4b8   :  { %2210 = vtanh.f32 %v798_v2 }
 0x4c2   :  { %v2211_v25 = vpop.eup %2210 }
 0x4c3   :  { %v801_v26 = vmul.f32 %v2211_v25, %v800_v24 }
 0x4c5   :  { %v806_v28 = vadd.f32 %v805_v23, %v801_v26 }
 0x4c7   :  { %v807_v29 = vpack.c.bf16 %v806_v28, %v806_v28  ;;  %v915_v59 = vrot.slane %v806_v28, 6 }
 0x4c9   :  { %v809_v36 = vrot.slane %v807_v29, 3 }
 0x4cb   :  { %1899 = vmatmul.mubr.msk.bf16.vlgmr.msra.gmra.mrb[24].mxu1 %vm72_vm1, %v809_v36  ;;  %2044 = vmatmul.mubr.msk.bf16.vlgmr.msra.gmra.mrb[20].mxu0 %vm72_vm1, %v809_v36 }
 0x4cc   :  { %924 = vmatpush1.bf16.msra.mxu1 %v2398_v32  ;;  %2048 = vmatpush3.bf16.msra.mxu0 %v2385_v27 }
 0x4cd   :  { %925 = vmatprep.subr.bf16.mxu1 %v2401_v33  ;;  %2049 = vmatprep.subr.bf16.mxu0 %v2289_v1 }
 0x4ce   :  { %955 = vmatprep.mubr.bf16.mxu1 %v2288_v0  ;;  %2051 = vmatprep.mubr.msk.bf16.mxu0 %vm2290_vm0, %v2289_v1 }
 0x4d0   :  { %926 = vmatpush1.bf16.msra.mxu1 %v2407_v34  ;;  %2050 = vmatpush3.bf16.msra.mxu0 %v2393_v31 }
 0x4d1   :  { %1044 = vmatprep.subr.bf16.mxu1 %v2390_v30  ;;  %2055 = vmatprep.subr.bf16.mxu0 %v2289_v1 }
 0x59e   :  { %v847_v15 = vpop.f32.mrb[24].mxu1  ;;  %v888_v37 = vpop.f32.mrb[20].mxu0 }
 0x59f   :  { %v894_v38 = vadd.f32 %v847_v15, %v2448_v54  ;;  %v849_v39 = vpop.f32.mrb[25].mxu1  ;;  %v2045_v40 = vpop.f32.mrb[21].mxu0  ;;  %v908_v56 = vadd.f32 %v888_v37, %v2461_v11 }
 0x5a0   :  { %v895_v41 = vadd.f32 %v849_v39, %v2450_v57  ;;  %v851_v42 = vpop.f32.mrb[26].mxu1  ;;  %v891_v43 = vpop.f32.mrb[22].mxu0 }
 0x5a1   :  { %v1901_v45 = vmul.f32 -1.442695, %v894_v38  ;;  %v852_v48 = vpop.f32.mrb[27].mxu1  ;;  %v2046_v49 = vpop.f32.mrb[23].mxu0 }
 0x5a2   :  { %v1902_v50 = vmul.f32 -1.442695, %v895_v41 }
 0x5a3   :  { %2212 = vpow2.f32 %v1901_v45 }
 0x5a4   :  { %2214 = vpow2.f32 %v1902_v50 }
 0x5ad   :  { %v2213_v51 = vpop.eup %2212 }
 0x5ae   :  { %v2215_v52 = vpop.eup %2214  ;;  %v902_v53 = vadd.f32 1.0, %v2213_v51 }
 0x5af   :  { %v903_v55 = vadd.f32 1.0, %v2215_v52 }
 0x5b0   :  { %2216 = vrcp.f32 %v902_v53 }
 0x5b1   :  { %2218 = vrcp.f32 %v903_v55 }
 0x5ba   :  { %v2217_v58 = vpop.eup %2216 }
 0x5bb   :  { %v2219_v61 = vpop.eup %2218  ;;  %v909_v62 = vmul.f32 %v2217_v58, %v908_v56 }
 0x5bc   :  { %v917_v63 = vmul.f32 %v2219_v61, %v915_v59  ;;  %v912_v4 = vsub.f32 1.0, %v2219_v61 }
 0x5bd   :  { %v910_v3 = vadd.f32 %v909_v62, %v2438_v44 }
 0x5bf   :  { %2220 = vtanh.f32 %v910_v3 }
 0x5c9   :  { %v2221_v5 = vpop.eup %2220 }
 0x5ca   :  { %v913_v6 = vmul.f32 %v2221_v5, %v912_v4 }
 0x5cc   :  { %v918_v7 = vadd.f32 %v917_v63, %v913_v6 }
 0x5ce   :  { %v919_v8 = vpack.c.bf16 %v918_v7, %v918_v7  ;;  %v1034_v15 = vrot.slane %v918_v7, 6 }
 0x5d0   :  { %1903 = vmatmul.mubr.msk.bf16.vlgmr.msra.gmra.mrb[28].mxu1 %vm72_vm1, %v919_v8  ;;  %2052 = vmatmul.mubr.msk.bf16.vlgmr.msra.gmra.mrb[24].mxu0 %vm72_vm1, %v919_v8 }
 0x5d1   :  { %1045 = vmatpush1.bf16.msra.mxu1 %v2398_v32  ;;  %2056 = vmatpush3.bf16.msra.mxu0 %v2385_v27 }
 0x5d2   :  { %1046 = vmatprep.subr.bf16.mxu1 %v2401_v33  ;;  %2057 = vmatprep.subr.bf16.mxu0 %v2289_v1 }
 0x5d3   :  { %1076 = vmatprep.mubr.bf16.mxu1 %v2288_v0  ;;  %2059 = vmatprep.mubr.msk.bf16.mxu0 %vm2290_vm0, %v2289_v1 }
 0x5d5   :  { %1047 = vmatpush1.bf16.msra.mxu1 %v2407_v34  ;;  %2058 = vmatpush3.bf16.msra.mxu0 %v2393_v31 }
 0x5d6   :  { %1165 = vmatprep.subr.bf16.mxu1 %v2390_v30  ;;  %2063 = vmatprep.subr.bf16.mxu0 %v2289_v1 }
 0x6a3   :  { %v957_v9 = vpop.f32.mrb[28].mxu1  ;;  %v998_v10 = vpop.f32.mrb[24].mxu0 }
 0x6a4   :  { %v1006_v12 = vrot.slane %v957_v9, 6  ;;  %v959_v13 = vpop.f32.mrb[29].mxu1  ;;  %v2053_v14 = vpop.f32.mrb[25].mxu0  ;;  %v1024_v28 = vadd.f32 %v998_v10, %v2461_v11 }
 0x6a5   :  { %v1007_v17 = vrot.slane %v959_v13, 6  ;;  %v961_v18 = vpop.f32.mrb[30].mxu1  ;;  %v1001_v19 = vpop.f32.mrb[26].mxu0 }
 0x6a6   :  { %v1010_v20 = vadd.f32 %v1006_v12, %v2448_v54  ;;  %v962_v21 = vpop.f32.mrb[31].mxu1  ;;  %v2054_v60 = vpop.f32.mrb[27].mxu0  ;;  %v1026_v29 = vrot.slane %v1024_v28, 6 }
 0x6a7   :  { %v1011_v22 = vadd.f32 %v1007_v17, %v2450_v57  ;;  %v2158_v21 = vld [vmem:[#allocation2 + $0x18] ss:$48 sps:$4 sm:$0xff]   ;;  %v2160_v60 = vld [vmem:[#allocation2 + $0x1c] ss:$48 sps:$4 sm:$0xff]  }
 0x6a8   :  { %v1905_v23 = vmul.f32 -1.442695, %v1010_v20 }
 0x6a9   :  { %v1906_v2 = vmul.f32 -1.442695, %v1011_v22  ;;  %v2159_v22 = vld [vmem:[#allocation2 + $0x78] ss:$48 sps:$4 sm:$0xff]  }
 0x6aa   :  { %2222 = vpow2.f32 %v1905_v23  ;;  %v2578_v23 = vld [vmem:[%s2689_s1] sm:$0xff] }
 0x6ab   :  { %2224 = vpow2.f32 %v1906_v2  ;;  %v2583_v2 = vld [vmem:[%s2689_s1 + $0x8] sm:$0xff] }
 0x6b4   :  { %v2223_v30 = vpop.eup %2222 }
 0x6b5   :  { %v2225_v24 = vpop.eup %2224  ;;  %v1018_v25 = vadd.f32 1.0, %v2223_v30  ;;  %v2162_v30 = vld [vmem:[#allocation2 + $0x7c] ss:$48 sps:$4 sm:$0xff]  }
 0x6b6   :  { %v1019_v26 = vadd.f32 1.0, %v2225_v24  ;;  %v1318_v24 = vpack.c.bf16 %v2583_v2, %v2578_v23 }
 0x6b7   :  { %2226 = vrcp.f32 %v1018_v25  ;;  %v2161_v25 = vld [vmem:[#allocation2 + $0x20] ss:$48 sps:$4 sm:$0xff]  }
 0x6b8   :  { %2228 = vrcp.f32 %v1019_v26  ;;  %v2163_v26 = vld [vmem:[#allocation2 + $0x80] ss:$48 sps:$4 sm:$0xff]  }
 0x6c1   :  { %v2227_v36 = vpop.eup %2226 }
 0x6c2   :  { %v2229_v37 = vpop.eup %2228  ;;  %v1028_v38 = vmul.f32 %v2227_v36, %v1026_v29 }
 0x6c3   :  { %v1036_v39 = vmul.f32 %v2229_v37, %v1034_v15  ;;  %v1031_v41 = vsub.f32 1.0, %v2229_v37 }
 0x6c4   :  { %v1029_v40 = vadd.f32 %v1028_v38, %v2438_v44 }
 0x6c6   :  { %2230 = vtanh.f32 %v1029_v40 }
 0x6d0   :  { %v2231_v42 = vpop.eup %2230 }
 0x6d1   :  { %v1032_v43 = vmul.f32 %v2231_v42, %v1031_v41 }
 0x6d3   :  { %v1037_v45 = vadd.f32 %v1036_v39, %v1032_v43 }
 0x6d5   :  { %v1038_v48 = vpack.c.bf16 %v1037_v45, %v1037_v45  ;;  %v1155_v7 = vrot.slane %v1037_v45, 6 }
 0x6d7   :  { %v1040_v49 = vrot.slane %v1038_v48, 1 }
 0x6d9   :  { %1907 = vmatmul.mubr.msk.bf16.vlgmr.msra.gmra.mrb[32].mxu1 %vm72_vm1, %v1040_v49  ;;  %2060 = vmatmul.mubr.msk.bf16.vlgmr.msra.gmra.mrb[28].mxu0 %vm72_vm1, %v1040_v49 }
 0x6da   :  { %1166 = vmatpush1.bf16.msra.mxu1 %v2398_v32  ;;  %2064 = vmatpush3.bf16.msra.mxu0 %v2385_v27 }
 0x6db   :  { %1167 = vmatprep.subr.bf16.mxu1 %v2401_v33  ;;  %2065 = vmatprep.subr.bf16.mxu0 %v2289_v1 }
 0x6dc   :  { %1197 = vmatprep.mubr.bf16.mxu1 %v2288_v0  ;;  %2067 = vmatprep.mubr.msk.bf16.mxu0 %vm2290_vm0, %v2289_v1 }
 0x6de   :  { %1168 = vmatpush1.bf16.msra.mxu1 %v2407_v34  ;;  %2066 = vmatpush3.bf16.msra.mxu0 %v2393_v31 }
 0x6df   :  { %2071 = vmatprep.subr.bf16.mxu1 %v2289_v1  ;;  %2079 = vmatprep.subr.bf16.mxu0 %v2289_v1 }
 0x7ac   :  { %v1078_v32 = vpop.f32.mrb[32].mxu1  ;;  %v1119_v50 = vpop.f32.mrb[28].mxu0 }
 0x7ad   :  { %v1127_v27 = vrot.slane %v1078_v32, 4  ;;  %v1080_v51 = vpop.f32.mrb[33].mxu1  ;;  %v2061_v33 = vpop.f32.mrb[29].mxu0  ;;  %v1145_v4 = vadd.f32 %v1119_v50, %v2461_v11 }
 0x7ae   :  { %v1128_v52 = vrot.slane %v1080_v51, 4  ;;  %v1082_v53 = vpop.f32.mrb[34].mxu1  ;;  %v1122_v55 = vpop.f32.mrb[30].mxu0 }
 0x7af   :  { %v1131_v0 = vadd.f32 %v1127_v27, %v2448_v54  ;;  %v1083_v56 = vpop.f32.mrb[35].mxu1  ;;  %v2062_v58 = vpop.f32.mrb[31].mxu0  ;;  %v1147_v5 = vrot.slane %v1145_v4, 4  ;;  %v2291_v4 = vmov 1966171168  }
 0x7b0   :  { %v1132_v34 = vadd.f32 %v1128_v52, %v2450_v57 }
 0x7b1   :  { %v1909_v59 = vmul.f32 -1.442695, %v1131_v0 }
 0x7b2   :  { %v1910_v31 = vmul.f32 -1.442695, %v1132_v34 }
 0x7b3   :  { %2232 = vpow2.f32 %v1909_v59 }
 0x7b4   :  { %2234 = vpow2.f32 %v1910_v31 }
 0x7bd   :  { %v2233_v61 = vpop.eup %2232 }
 0x7be   :  { %v2235_v62 = vpop.eup %2234  ;;  %v1139_v63 = vadd.f32 1.0, %v2233_v61 }
 0x7bf   :  { %v1140_v3 = vadd.f32 1.0, %v2235_v62 }
 0x7c0   :  { %2236 = vrcp.f32 %v1139_v63 }
 0x7c1   :  { %2238 = vrcp.f32 %v1140_v3 }
 0x7ca   :  { %v2237_v6 = vpop.eup %2236 }
 0x7cb   :  { %v2239_v8 = vpop.eup %2238  ;;  %v1149_v9 = vmul.f32 %v2237_v6, %v1147_v5  ;;  %v1438_v5 = vunpack.c.l.s4 %v2291_v4 }
 0x7cc   :  { %v1157_v10 = vmul.f32 %v2239_v8, %v1155_v7  ;;  %v1152_v13 = vsub.f32 1.0, %v2239_v8  ;;  %v1309_v7 = vld [vmem:[%s2693_s5 + $0xa] ss:$0 sm:$0xff]  ;;  %v1308_v8 = vld [vmem:[%s2693_s5 + $0x2] ss:$0 sm:$0xff] }
 0x7cd   :  { %v1150_v12 = vadd.f32 %v1149_v9, %v2438_v44  ;;  %v1439_v6 = vunpack.c.0.s8 %v1438_v5 }
 0x7cf   :  { %2240 = vtanh.f32 %v1150_v12 }
 0x7d9   :  { %v2241_v14 = vpop.eup %2240 }
 0x7da   :  { %v1153_v17 = vmul.f32 %v2241_v14, %v1152_v13  ;;  %v1442_v13 = vsub.s32 %v1439_v6, %v2426_v35 }
 0x7dc   :  { %v1158_v18 = vadd.f32 %v1157_v10, %v1153_v17 }
 0x7de   :  { %v1159_v19 = vpack.c.bf16 %v1158_v18, %v1158_v18  ;;  %v1276_v53 = vrot.slane %v1158_v18, 6 }
 0x7e0   :  { %v1161_v20 = vrot.slane %v1159_v19, 2 }
 0x7e2   :  { %1911 = vmatmul.mubr.msk.bf16.vlgmr.msra.gmra.mrb[36].mxu1 %vm72_vm1, %v1161_v20  ;;  %2068 = vmatmul.mubr.msk.bf16.vlgmr.msra.gmra.mrb[32].mxu0 %vm72_vm1, %v1161_v20 }
 0x7e3   :  { %2075 = vmatprep.mubr.msk.bf16.mxu1 %vm2290_vm0, %v2289_v1  ;;  %2083 = vmatprep.mubr.msk.bf16.mxu0 %vm2290_vm0, %v2289_v1 }
 0x7e4   :  { %2072 = vmatpush3.bf16.msra.mxu1 %v2158_v21  ;;  %2080 = vmatpush3.bf16.msra.mxu0 %v2160_v60 }
 0x7e5   :  { %2073 = vmatprep.subr.bf16.mxu1 %v2289_v1  ;;  %2081 = vmatprep.subr.bf16.mxu0 %v2289_v1 }
 0x7e8   :  { %2074 = vmatpush3.bf16.msra.mxu1 %v2159_v22  ;;  %2082 = vmatpush3.bf16.msra.mxu0 %v2162_v30 }
 0x7e9   :  { %2087 = vmatprep.subr.bf16.mxu1 %v2289_v1  ;;  %2095 = vmatprep.subr.bf16.mxu0 %v2289_v1 }
 0x7eb   :  { %2076 = vmatmul.mubr.msk.bf16.vlgmr.msra.gmra.mrb[40].mxu1 %vm72_vm1, %v1318_v24 }
 0x7ec   :  { %2088 = vmatpush3.bf16.msra.mxu1 %v2161_v25  ;;  %2091 = vmatprep.mubr.msk.bf16.mxu1 %vm2290_vm0, %v2289_v1 }
 0x7ed   :  { %2089 = vmatprep.subr.bf16.mxu1 %v2289_v1 }
 0x7f0   :  { %2090 = vmatpush3.bf16.msra.mxu1 %v2163_v26 }
 0x7f1   :  { %2103 = vmatprep.subr.bf16.mxu1 %v2289_v1 }
 0x8b5   :  { %v1199_v28 = vpop.f32.mrb[36].mxu1  ;;  %v1240_v29 = vpop.f32.mrb[32].mxu0 }
 0x8b6   :  { %v1248_v36 = vrot.slane %v1199_v28, 2  ;;  %v1201_v15 = vpop.f32.mrb[37].mxu1  ;;  %v2069_v37 = vpop.f32.mrb[33].mxu0  ;;  %v1266_v51 = vadd.f32 %v1240_v29, %v2461_v11  ;;  %v2605_v11 = vld [vmem:[%s2694_s6 + $0x10] sm:$0xff] }
 0x8b7   :  { %v1249_v38 = vrot.slane %v1201_v15, 2  ;;  %v1203_v39 = vpop.f32.mrb[38].mxu1  ;;  %v1243_v40 = vpop.f32.mrb[34].mxu0  ;;  %v1314_v15 = vld [vmem:[%s2693_s5 + $0x4] ss:$0 sm:$0xff] }
 0x8b8   :  { %v1252_v41 = vadd.f32 %v1248_v36, %v2448_v54  ;;  %v1204_v42 = vpop.f32.mrb[39].mxu1  ;;  %v2070_v43 = vpop.f32.mrb[35].mxu0  ;;  %v1268_v33 = vrot.slane %v1266_v51, 2 }
 0x8b9   :  { %v1253_v45 = vadd.f32 %v1249_v38, %v2450_v57  ;;  %v1501_v43 = vld [vmem:[%s2690_s2] sm:$0x3] }
 0x8ba   :  { %v1913_v48 = vmul.f32 -1.442695, %v1252_v41 }
 0x8bb   :  { %v1914_v49 = vmul.f32 -1.442695, %v1253_v45  ;;  %v1506_v45 = vrot.slane %v1501_v43, %v2441_v46 }
 0x8bc   :  { %2242 = vpow2.f32 %v1913_v48  ;;  %v1315_v48 = vld [vmem:[%s2693_s5 + $0xc] ss:$0 sm:$0xff] }
 0x8bd   :  { %2244 = vpow2.f32 %v1914_v49  ;;  %v1513_v49 = vrot.slane %v1501_v43, %v2444_v47 }
 0x8c6   :  { %v2243_v32 = vpop.eup %2242 }
 0x8c7   :  { %v2245_v1 = vpop.eup %2244  ;;  %v1260_v50 = vadd.f32 1.0, %v2243_v32 }
 0x8c8   :  { %v1261_v27 = vadd.f32 1.0, %v2245_v1 }
 0x8c9   :  { %2246 = vrcp.f32 %v1260_v50 }
 0x8ca   :  { %2248 = vrcp.f32 %v1261_v27  ;;  %v2635_v27 = vsub.s32 %v2374_v16, %v2426_v35 }
 0x8d3   :  { %v2247_v52 = vpop.eup %2246 }
 0x8d4   :  { %v2249_v54 = vpop.eup %2248  ;;  %v1270_v55 = vmul.f32 %v2247_v52, %v1268_v33 }
 0x8d5   :  { %v1278_v0 = vmul.f32 %v2249_v54, %v1276_v53  ;;  %v1273_v56 = vsub.f32 1.0, %v2249_v54 }
 0x8d6   :  { %v1271_v57 = vadd.f32 %v1270_v55, %v2438_v44  ;;  %v1368_v44 = vpop.f32.mrb[40].mxu1 }
 0x8d7   :  { %v2077_v62 = vpop.f32.mrb[41].mxu1  ;;  %v1369_v20 = vadd.f32 %v1368_v44, %v1308_v8 }
 0x8d8   :  { %2250 = vtanh.f32 %v1271_v57  ;;  %v1371_v63 = vpop.f32.mrb[42].mxu1 }
 0x8d9   :  { %v2078_v3 = vpop.f32.mrb[43].mxu1  ;;  %v1375_v24 = vmax.f32 %v1369_v20, 0.0  ;;  %v1372_v25 = vadd.f32 %v1371_v63, %v1308_v8 }
 0x8db   :  { %v1376_v37 = vmax.f32 %v1372_v25, 0.0 }
 0x8e2   :  { %v2251_v58 = vpop.eup %2250 }
 0x8e3   :  { %v1274_v34 = vmul.f32 %v2251_v58, %v1273_v56 }
 0x8e5   :  { %v1279_v59 = vadd.f32 %v1278_v0, %v1274_v34 }
 0x8e7   :  { %v1377_v31 = vpack.c.bf16 %v1279_v59, %v1279_v59 }
 0x8e9   :  { %v1379_v61 = vrot.slane %v1377_v31, 3 }
 0x8eb   :  { %2084 = vmatmul.mubr.msk.bf16.vlgmr.msra.gmra.mrb[36].mxu0 %vm72_vm1, %v1379_v61  ;;  %2092 = vmatmul.mubr.msk.bf16.vlgmr.msra.gmra.mrb[44].mxu1 %vm72_vm1, %v1379_v61 }
 0x8ec   :  { %2099 = vmatprep.mubr.msk.bf16.mxu0 %vm2290_vm0, %v2605_v11  ;;  %2107 = vmatprep.mubr.msk.bf16.mxu1 %vm2290_vm0, %v2605_v11 }
 0x9be   :  { %v1429_v9 = vpop.f32.mrb[36].mxu0  ;;  %v2617_v10 = vpop.f32.mrb[44].mxu1 }
 0x9bf   :  { %v1430_v12 = vadd.f32 %v1429_v9, %v1309_v7  ;;  %v2085_v14 = vpop.f32.mrb[37].mxu0  ;;  %v2093_v17 = vpop.f32.mrb[45].mxu1 }
 0x9c0   :  { %v1432_v18 = vpop.f32.mrb[38].mxu0  ;;  %v1635_v19 = vpop.f32.mrb[46].mxu1 }
 0x9c1   :  { %v1435_v21 = vmax.f32 %v1430_v12, 0.0  ;;  %v2086_v60 = vpop.f32.mrb[39].mxu0  ;;  %v2094_v22 = vpop.f32.mrb[47].mxu1 }
 0x9c3   :  { %v1443_v30 = vrot.slane %v1435_v21, %v1442_v13 }
 0x9c5   :  { %v1444_v26 = vcombine.high %v1443_v30, %v1443_v30  ;;  %v1451_v28 = vrot.slane %v1443_v30, %v1442_v13 }
 0x9c7   :  { %v1458_v29 = vrot.slane %v1444_v26, %v1442_v13  ;;  %v1462_v36 = vrot.slane %v1451_v28, %v2441_v46  ;;  %v2164_v26 = vld [vmem:[#allocation2 + $0x24] ss:$48 sps:$4 sm:$0xff]  }
 0x9c8   :  { %2096 = vmatpush3.bf16.msra.mxu0 %v2164_v26  ;;  %v2165_v28 = vld [vmem:[#allocation2 + $0x84] ss:$48 sps:$4 sm:$0xff]  }
 0x9c9   :  { %v1469_v38 = vmul.f32 %v1462_v36, %v1375_v24  ;;  %v1466_v39 = vrot.slane %v1458_v29, %v2441_v46  ;;  %2097 = vmatprep.subr.bf16.mxu0 %v2605_v11 }
 0x9cb   :  { %v1471_v40 = vmul.f32 %v1469_v38, %v1314_v15  ;;  %v1470_v41 = vmul.f32 %v1466_v39, %v1376_v37 }
 0x9cc   :  { %2098 = vmatpush3.bf16.msra.mxu0 %v2165_v28 }
 0x9cd   :  { %1473 = vadd.xlane.f32.xlu0 %v1471_v40  ;;  %v1472_v42 = vmul.f32 %v1470_v41, %v1314_v15  ;;  %2111 = vmatprep.subr.bf16.mxu0 %v2605_v11 }
 0x9cf   :  { %1475 = vadd.xlane.f32.xlu1 %v1472_v42 }
 0x9e0   :  { %1508 = vbcast.lane.b32.xlu1 %v1506_v45, 256 }
 0x9e3   :  { %1479 = vperm.xlu0 %2140, %v1315_v48  }
 0x9e7   :  { %1515 = vbcast.lane.b32.xlu0 %v1513_v49, 256 }
 0xa5a   :  { %v1474_v32 = vpop.xlane.xlu0 %1473 }
 0xa5c   :  { %v1476_v1 = vpop.xlane.xlu1 %1475 }
 0xa60   :  { %v1509_v3 = vpop.permute.xlu1 %1508 }
 0xa62   :  { %v1480_v50 = vpop.permute.xlu0 %1479 }
 0xa63   :  { %v1482_v51 = vadd.f32 %v1480_v50, %v1474_v32  ;;  %v1483_v33 = vadd.f32 %v1480_v50, %v1476_v1 }
 0xa65   :  { %v1484_v52 = vsub.f32 1.0, %v1482_v51  ;;  %v1485_v53 = vsub.f32 1.0, %v1483_v33  ;;  %v1486_v54 = vmax.f32 %v1482_v51, %v1483_v33 }
 0xa66   :  { %v1516_v4 = vpop.permute.xlu0 %1515 }
 0xa67   :  { %v1852_v55 = vrot.slane %v1484_v52, %v2635_v27  ;;  %v1856_v0 = vrot.slane %v1485_v53, %v2635_v27  ;;  %v1487_v57 = vrot.slane %v1486_v54, 4 }
 0xa69   :  { %v1488_v56 = vmax.f32 %v1486_v54, %v1487_v57  ;;  %v1857_v58 = vsel %vm1537_vm6, %v1856_v0, %v1852_v55  ;;  %v2166_v0 = vld [vmem:[#allocation2 + $0x28] ss:$48 sps:$4 sm:$0xff]  }
 0xa6a   :  { %1859 = vst.msk [vmem:[%s2694_s6 + $0x14] sm:$0x3] %vm1540_vm7, %v1857_v58  ;;  %2104 = vmatpush3.bf16.msra.mxu1 %v2166_v0  ;;  %v2167_v57 = vld [vmem:[#allocation2 + $0x88] ss:$48 sps:$4 sm:$0xff]   ;;  %v2169_v58 = vld [vmem:[#allocation2 + $0x8c] ss:$48 sps:$4 sm:$0xff]  }
 0xa6b   :  { %v1489_v16 = vrot.slane %v1488_v56, 2  ;;  %2105 = vmatprep.subr.bf16.mxu1 %v2605_v11 }
 0xa6d   :  { %v1490_v35 = vmax.f32 %v1488_v56, %v1489_v16  ;;  %v2168_v56 = vld [vmem:[#allocation2 + $0x2c] ss:$48 sps:$4 sm:$0xff]   ;;  %v1310_v16 = vld [vmem:[%s2693_s5 + $0x12] ss:$0 sm:$0xff] }
 0xa6e   :  { %2106 = vmatpush3.bf16.msra.mxu1 %v2167_v57 }
 0xa6f   :  { %v1491_v34 = vrot.slane %v1490_v35, 1 }
 0xa71   :  { %v1492_v59 = vmax.f32 %v1490_v35, %v1491_v34  ;;  %v1311_v35 = vld [vmem:[%s2693_s5 + $0x3] ss:$0 sm:$0xff]  ;;  %v1633_v34 = vadd.f32 %v2617_v10, %v1310_v16  ;;  %v1312_v10 = vld [vmem:[%s2693_s5 + $0xb] ss:$0 sm:$0xff] }
 0xa73   :  { %2131 = vpush %v1492_v59 }
 0xaa4   :  { %s2132_s25 = spop %2131 }
 0xaa5   :  { %v1494_v31 = vstv %s2132_s25 }
 0xaa6   :  { %v1495_v61 = vsub.f32 %v1482_v51, %v1494_v31  ;;  %v1496_v44 = vsub.f32 %v1483_v33, %v1494_v31 }
 0xaa8   :  { %v1497_v62 = vmul.f32 1.442695, %v1495_v61  ;;  %v1499_v63 = vmul.f32 1.442695, %v1496_v44 }
 0xaaa   :  { %2252 = vpow2.f32 %v1497_v62  ;;  %v1638_v62 = vmax.f32 %v1633_v34, 0.0 }
 0xaab   :  { %2254 = vpow2.f32 %v1499_v63 }
 0xab4   :  { %v2253_v5 = vpop.eup %2252 }
 0xab5   :  { %v2255_v6 = vpop.eup %2254  ;;  %v1519_v7 = vmul.f32 %v2253_v5, %v1509_v3 }
 0xab6   :  { %v1520_v8 = vmul.f32 %v2255_v6, %v1516_v4  ;;  %v2170_v6 = vld [vmem:[#allocation2 + $0xec] ss:$48 sps:$4 sm:$0xff]  }
 0xab7   :  { %1524 = vperm.xlu1 %2141, %v1519_v7  }
 0xab8   :  { %1527 = vperm.xlu0 %2140, %v1520_v8  }
 0xb36   :  { %v1525_v9 = vpop.permute.xlu1 %1524 }
 0xb37   :  { %v1528_v12 = vpop.permute.xlu0 %1527  ;;  %v1532_v13 = vrot.slane %v1525_v9, %v2635_v27 }
 0xb38   :  { %v1536_v14 = vrot.slane %v1528_v12, %v2635_v27 }
 0xb3a   :  { %v1538_v17 = vsel %vm1537_vm6, %v1536_v14, %v1532_v13 }
 0xb3b   :  { %v1541_v18 = vsel %vm1540_vm7, %v1538_v17, 0.0 }
 0xb3c   :  { %1542 = vadd.xlane.f32.xlu1 %v1541_v18 }
 0xbc9   :  { %v1543_v19 = vpop.xlane.xlu1 %1542 }
 0xbca   :  { %v1544_v20 = vadd.f32 1e-05, %v1543_v19  ;;  %v1313_v19 = vld [vmem:[%s2693_s5 + $0x13] ss:$0 sm:$0xff] }
 0xbcc   :  { %v1549_v21 = vrot.slane %v1544_v20, %v2441_v46  ;;  %v1553_v60 = vrot.slane %v1544_v20, %v2444_v47 }
 0xbce   :  { %2256 = vrcp.f32 %v1549_v21 }
 0xbcf   :  { %2258 = vrcp.f32 %v1553_v60 }
 0xbd8   :  { %v2257_v22 = vpop.eup %2256 }
 0xbd9   :  { %v1557_v30 = vmul.f32 %v2257_v22, %v1519_v7  ;;  %v2259_v24 = vpop.eup %2258  ;;  %v2171_v7 = vld [vmem:[#allocation2 + $0x14c] ss:$48 sps:$4 sm:$0xff]  }
 0xbda   :  { %v1559_v25 = vmul.f32 %v2259_v24, %v1520_v8 }
 0xbdb   :  { %1562 = vperm.xlu0 %2140, %v1557_v30  }
 0xbdf   :  { %1567 = vperm.xlu0 %2140, %v1559_v25  }
 0xc5a   :  { %v1563_v29 = vpop.permute.xlu0 %1562 }
 0xc5b   :  { %v1570_v46 = vmul.f32 %v1563_v29, %v2578_v23  ;;  %v1839_v37 = vrot.slane %v1563_v29, %v2635_v27 }
 0xc5d   :  { %v1572_v47 = vsel %vm72_vm1, %v1570_v46, 0.0 }
 0xc5e   :  { %v1573_v36 = vrot.slane %v1572_v47, 4  ;;  %v1568_v15 = vpop.permute.xlu0 %1567 }
 0xc5f   :  { %v1571_v38 = vmul.f32 %v1568_v15, %v2583_v2  ;;  %v1843_v39 = vrot.slane %v1568_v15, %v2635_v27 }
 0xc60   :  { %v1574_v40 = vadd.f32 %v1573_v36, %v1572_v47 }
 0xc61   :  { %v1579_v41 = vsel %vm72_vm1, %v1571_v38, 0.0  ;;  %v1844_v42 = vsel %vm1537_vm6, %v1843_v39, %v1839_v37 }
 0xc62   :  { %v1575_v43 = vrot.slane %v1574_v40, 2  ;;  %v1580_v45 = vrot.slane %v1579_v41, 4  ;;  %1846 = vst.msk [vmem:[%s2694_s6 + $0x12] sm:$0x3] %vm1540_vm7, %v1844_v42 }
 0xc64   :  { %v1576_v23 = vadd.f32 %v1575_v43, %v1574_v40  ;;  %v1581_v48 = vadd.f32 %v1580_v45, %v1579_v41 }
 0xc66   :  { %v1577_v49 = vrot.slane %v1576_v23, 1  ;;  %v1582_v32 = vrot.slane %v1581_v48, 2 }
 0xc68   :  { %v1578_v1 = vadd.f32 %v1577_v49, %v1576_v23  ;;  %v1583_v2 = vadd.f32 %v1582_v32, %v1581_v48 }
 0xc6a   :  { %v1584_v50 = vrot.slane %v1583_v2, 1  ;;  %v1639_v27 = vpack.c.bf16 %v1578_v1, %v1578_v1 }
 0xc6c   :  { %v1585_v51 = vadd.f32 %v1584_v50, %v1583_v2  ;;  %v1643_v52 = vunpack.c.l.b16 %v1639_v27 }
 0xc6e   :  { %v1640_v33 = vpack.c.bf16 %v1585_v51, %v1585_v51 }
 0xc70   :  { %v1644_v53 = vunpack.c.l.b16 %v1640_v33 }
 0xc72   :  { %v1645_v54 = vsel %vm1537_vm6, %v1644_v53, %v1643_v52 }
 0xc73   :  { %v1646_v55 = vpack.c.b16 %v1645_v54, %v1645_v54 }
 0xc75   :  { %2100 = vmatmul.mubr.msk.bf16.vlgmr.msra.gmra.mrb[40].mxu0 %vm72_vm1, %v1646_v55 }
 0xc76   :  { %2119 = vmatprep.mubr.msk.bf16.mxu0 %vm2290_vm0, %v2605_v11  ;;  %2112 = vmatpush3.bf16.msra.mxu0 %v2168_v56 }
 0xc77   :  { %2113 = vmatprep.subr.bf16.mxu0 %v2605_v11 }
 0xc7a   :  { %2114 = vmatpush3.bf16.msra.mxu0 %v2169_v58 }
 0xc7b   :  { %2115 = vmatprep.subr.bf16.mxu0 %v2605_v11 }
 0xc7e   :  { %2116 = vmatpush3.bf16.msra.mxu0 %v2170_v6 }
 0xc7f   :  { %2117 = vmatprep.subr.bf16.mxu0 %v2605_v11 }
 0xc82   :  { %2118 = vmatpush3.bf16.msra.mxu0 %v2171_v7 }
 0xd48   :  { %v1696_v59 = vpop.f32.mrb[40].mxu0 }
 0xd49   :  { %v1697_v31 = vadd.f32 %v1696_v59, %v1311_v35  ;;  %v2101_v61 = vpop.f32.mrb[41].mxu0 }
 0xd4a   :  { %v1699_v44 = vpop.f32.mrb[42].mxu0 }
 0xd4b   :  { %v1702_v63 = vmax.f32 %v1697_v31, 0.0  ;;  %v2102_v3 = vpop.f32.mrb[43].mxu0 }
 0xd4d   :  { %v1703_v4 = vmul.f32 %v1702_v63, %v1638_v62 }
 0xd4f   :  { %v1704_v5 = vpack.c.bf16 %v1703_v4, %v1703_v4 }
 0xd51   :  { %2108 = vmatmul.mubr.msk.bf16.vlgmr.msra.gmra.mrb[48].mxu1 %vm72_vm1, %v1704_v5 }
 0xe24   :  { %v1754_v8 = vpop.f32.mrb[48].mxu1 }
 0xe25   :  { %v1755_v9 = vadd.f32 %v1754_v8, %v1312_v10  ;;  %v2109_v12 = vpop.f32.mrb[49].mxu1 }
 0xe26   :  { %v1757_v13 = vpop.f32.mrb[50].mxu1 }
 0xe27   :  { %v1760_v14 = vmax.f32 %v1755_v9, 0.0  ;;  %v2110_v17 = vpop.f32.mrb[51].mxu1 }
 0xe29   :  { %v1761_v18 = vpack.c.bf16 %v1760_v14, %v1760_v14 }
 0xe2b   :  { %2120 = vmatmul.mubr.msk.bf16.vlgmr.msra.gmra.mrb[44].mxu0 %vm1786_vm8, %v1761_v18 }
 0xefe   :  { %v1824_v11 = vpop.f32.mrb[44].mxu0 }
 0xeff   :  { %v1825_v20 = vadd.f32 %v1824_v11, %v1313_v19  ;;  %v2121_v21 = vpop.f32.mrb[45].mxu0 }
 0xf00   :  { %v1827_v60 = vpop.f32.mrb[46].mxu0 }
 0xf01   :  { %1835 = vst [vmem:[%s2694_s6 + $0x10] sm:$0x3] %v1825_v20  ;;  %v2122_v22 = vpop.f32.mrb[47].mxu0 }
 0xf02   :  { %1864 = vsyncpa [#allocation3], 1 }

</bundles_post_ra>
